<compile_context>
chip_gen: v7x
topology: tpu7x:2x2x1
jax: 0.10.0
libtpu: 0.0.40
codegen_flags: <defaults>
</compile_context>

<pallas_src>
import jax
import jax.numpy as jnp
from jax.experimental import pallas as pl
from jax.experimental.pallas import tpu as pltpu

# ----------------------------- model dims ----------------------------------
B, S, D = 2, 8, 32          # batch, sequence length, transformer width
H = 4                       # attention heads
HD = D // H                 # head dim
MLP = 4 * D                 # c_fc width
P = 16                      # text_projection output dim
VOCAB = 49                  # vocabulary size
N_LAYERS = 2                # transformer depth
EPS = 1e-5

# packed per-layer vector rows (shape (N_LAYERS, 9, D)):
#   0: ln1_gamma  1: ln1_beta  2: bq  3: bk  4: bv  5: bo
#   6: ln2_gamma  7: ln2_beta  8: b_proj(mlp)


def _layer_norm(x, g, b):
    mu = jnp.mean(x, axis=-1, keepdims=True)
    var = jnp.mean((x - mu) ** 2, axis=-1, keepdims=True)
    return (x - mu) * jax.lax.rsqrt(var + EPS) * g + b


# ----------------------- fused encoder kernel ------------------------------
def _encoder_kernel(eot_ref,                      # scalar-prefetch (SMEM)
                    x_ref, wqkv_ref, wo_ref, wfc_ref, wpr_ref,
                    vecs_ref, bfc_ref, fin_ref, wp_ref,
                    att_ref, proj_ref):
    # activations stay flattened (B*S, D) for all dense matmuls
    x = x_ref[...].reshape(B * S, D)

    # causal mask built once, reused by every layer / head
    qi = jax.lax.broadcasted_iota(jnp.int32, (S, S), 0)
    ki = jax.lax.broadcasted_iota(jnp.int32, (S, S), 1)
    causal = (ki <= qi)[None]                    # (1, S, S)
    scale = 1.0 / (HD ** 0.5)

    for l in range(N_LAYERS):                    # static unrolled layer loop
        wqkv = wqkv_ref[l]                       # (D, 3D)
        wo = wo_ref[l]                           # (D, D)
        wfc = wfc_ref[l]                         # (D, MLP)
        wpr = wpr_ref[l]                         # (MLP, D)
        vec = vecs_ref[l]                        # (9, D)
        bfc = bfc_ref[l]                         # (1, MLP)

        ln1g, ln1b = vec[0:1, :], vec[1:2, :]
        bq, bk, bv = vec[2:3, :], vec[3:4, :], vec[4:5, :]
        bo = vec[5:6, :]
        ln2g, ln2b = vec[6:7, :], vec[7:8, :]
        bpr = vec[8:9, :]

        # ---- attention sub-block (pre-LN) --------------------------------
        xn = _layer_norm(x, ln1g, ln1b)                               # (BS, D)
        qkv = jnp.dot(xn, wqkv, preferred_element_type=jnp.float32)  # (BS, 3D)
        q = (qkv[:, 0:D] + bq).reshape(B, S, D)
        k = (qkv[:, D:2 * D] + bk).reshape(B, S, D)
        v = (qkv[:, 2 * D:3 * D] + bv).reshape(B, S, D)

        heads = []
        for h in range(H):                        # static head loop, batched B
            sl = slice(h * HD, (h + 1) * HD)
            qh, kh, vh = q[:, :, sl], k[:, :, sl], v[:, :, sl]   # (B, S, HD)
            sc = jnp.einsum('bqd,bkd->bqk', qh, kh,
                            preferred_element_type=jnp.float32) * scale
            sc = jnp.where(causal, sc, -1e30)
            m = jnp.max(sc, axis=-1, keepdims=True)
            p = jnp.exp(sc - m)
            attw = p * pl.reciprocal(jnp.sum(p, axis=-1, keepdims=True),
                                     approx=True)
            heads.append(jnp.einsum('bqk,bkd->bqd', attw, vh,
                                    preferred_element_type=jnp.float32))
        attn = jnp.concatenate(heads, axis=-1).reshape(B * S, D)
        x = x + jnp.dot(attn, wo, preferred_element_type=jnp.float32) + bo

        # ---- MLP sub-block (QuickGELU, as in CLIP) ------------------------
        xn2 = _layer_norm(x, ln2g, ln2b)
        hid = jnp.dot(xn2, wfc, preferred_element_type=jnp.float32) + bfc
        hid = hid * jax.nn.sigmoid(1.702 * hid)
        x = x + jnp.dot(hid, wpr, preferred_element_type=jnp.float32) + bpr

    # ---- ln_final + per-token output ------------------------------------
    lng, lnb = fin_ref[0:1, :], fin_ref[1:2, :]
    xn = _layer_norm(x, lng, lnb)
    att_ref[...] = xn.reshape(B, S, D)

    # ---- EOT-row gather (dynamic sublane slice) + projection -------------
    rows = []
    for b in range(B):
        e = eot_ref[b]                                   # scalar from SMEM
        rows.append(att_ref[b, pl.ds(e, 1), :])          # (1, D)
    eot_x = jnp.concatenate(rows, axis=0)                # (B, D)
    proj_ref[...] = jnp.dot(eot_x, wp_ref[...],
                            preferred_element_type=jnp.float32)


def encoder_call(x, eot_idx, params):
    grid_spec = pltpu.PrefetchScalarGridSpec(
        num_scalar_prefetch=1,
        grid=(1,),
        in_specs=[
            pl.BlockSpec((B, S, D), lambda i, e: (0, 0, 0)),
            pl.BlockSpec((N_LAYERS, D, 3 * D), lambda i, e: (0, 0, 0)),
            pl.BlockSpec((N_LAYERS, D, D), lambda i, e: (0, 0, 0)),
            pl.BlockSpec((N_LAYERS, D, MLP), lambda i, e: (0, 0, 0)),
            pl.BlockSpec((N_LAYERS, MLP, D), lambda i, e: (0, 0, 0)),
            pl.BlockSpec((N_LAYERS, 9, D), lambda i, e: (0, 0, 0)),
            pl.BlockSpec((N_LAYERS, 1, MLP), lambda i, e: (0, 0, 0)),
            pl.BlockSpec((2, D), lambda i, e: (0, 0)),
            pl.BlockSpec((D, P), lambda i, e: (0, 0)),
        ],
        out_specs=[
            pl.BlockSpec((B, S, D), lambda i, e: (0, 0, 0)),
            pl.BlockSpec((B, P), lambda i, e: (0, 0)),
        ],
    )
    att, proj = pl.pallas_call(
        _encoder_kernel,
        grid_spec=grid_spec,
        out_shape=(jax.ShapeDtypeStruct((B, S, D), jnp.float32),
                   jax.ShapeDtypeStruct((B, P), jnp.float32)),
        compiler_params=pltpu.CompilerParams(
            dimension_semantics=("arbitrary",)),
    )(eot_idx, x, params["wqkv"], params["wo"], params["wfc"], params["wpr"],
      params["vecs"], params["bfc"], params["ln_final"],
      params["text_projection"])
    return proj, att


# ------------------------------ parameters ---------------------------------
def init_params(key):
    keys = iter(jax.random.split(key, 8 + 16 * N_LAYERS))

    def nrm(shape, scale=0.02):
        return (scale * jax.random.normal(next(keys), shape)).astype(jnp.float32)

    wqkv_s, wo_s, wfc_s, wpr_s, vec_s, bfc_s = [], [], [], [], [], []
    for _ in range(N_LAYERS):
        ln1g = 1.0 + nrm((D,), 0.02); ln1b = nrm((D,), 0.02)
        wq = nrm((D, D), 0.05); bq = nrm((D,), 0.02)
        wk = nrm((D, D), 0.05); bk = nrm((D,), 0.02)
        wv = nrm((D, D), 0.05); bv = nrm((D,), 0.02)
        wo = nrm((D, D), 0.05); bo = nrm((D,), 0.02)
        ln2g = 1.0 + nrm((D,), 0.02); ln2b = nrm((D,), 0.02)
        wfc = nrm((D, MLP), 0.05); bfc = nrm((MLP,), 0.02)
        wpr = nrm((MLP, D), 0.05); bpr = nrm((D,), 0.02)
        wqkv_s.append(jnp.concatenate([wq, wk, wv], axis=1))   # (D, 3D)
        wo_s.append(wo); wfc_s.append(wfc); wpr_s.append(wpr)
        vec_s.append(jnp.stack([ln1g, ln1b, bq, bk, bv, bo,
                                ln2g, ln2b, bpr]))             # (9, D)
        bfc_s.append(bfc[None])                                # (1, MLP)

    params = {
        "token_embedding": nrm((VOCAB, D), 0.02),
        "positional_embedding": nrm((S, D), 0.01),
        "ln_final": jnp.stack([1.0 + nrm((D,), 0.02), nrm((D,), 0.02)]),
        "text_projection": nrm((D, P), 0.05),
        "wqkv": jnp.stack(wqkv_s),
        "wo": jnp.stack(wo_s),
        "wfc": jnp.stack(wfc_s),
        "wpr": jnp.stack(wpr_s),
        "vecs": jnp.stack(vec_s),
        "bfc": jnp.stack(bfc_s),
    }
    return params


# ------------------------------- forward -----------------------------------
def text_encoder_forward(text, params):
    # glue: embedding gather + positional add + argmax (pure JAX)
    x = params["token_embedding"][text] + params["positional_embedding"][None]
    x = x.astype(jnp.float32)                                  # (B, S, D)
    eot_idx = jnp.argmax(text, axis=-1).astype(jnp.int32)      # (B,)
    proj, att = encoder_call(x, eot_idx, params)
    # matches reference return: (projected EOT features, per-token LN states)
    return proj.astype(jnp.float32), att.astype(jnp.float32)


if __name__ == "__main__":
    key = jax.random.PRNGKey(0)
    params = init_params(key)

    tkey = jax.random.fold_in(key, 123)
    text = jax.random.randint(tkey, (B, S), 1, VOCAB - 1, dtype=jnp.int32)
    # place an EOT (maximal token id) in each sequence, as CLIP assumes
    eot_pos = jnp.array([S - 1, S // 2], dtype=jnp.int32)
    text = text.at[jnp.arange(B), eot_pos].set(VOCAB - 1)

    proj, att = jax.jit(text_encoder_forward)(text, params)
    jax.block_until_ready((proj, att))

    assert proj.shape == (B, P) and proj.dtype == jnp.float32
    assert att.shape == (B, S, D) and att.dtype == jnp.float32
    print("KERNEL_OK")
</pallas_src>

<mosaic_0001>
module attributes {stable_mosaic.version = 11 : i64} {
  func.func @_encoder_kernel(%arg0: i32, %arg1: memref<2xi32, #tpu.memory_space<smem>>, %arg2: memref<2x8x32xf32, #tpu.memory_space<vmem>>, %arg3: memref<2x32x96xf32, #tpu.memory_space<vmem>>, %arg4: memref<2x32x32xf32, #tpu.memory_space<vmem>>, %arg5: memref<2x32x128xf32, #tpu.memory_space<vmem>>, %arg6: memref<2x128x32xf32, #tpu.memory_space<vmem>>, %arg7: memref<2x9x32xf32, #tpu.memory_space<vmem>>, %arg8: memref<2x1x128xf32, #tpu.memory_space<vmem>>, %arg9: memref<2x32xf32, #tpu.memory_space<vmem>>, %arg10: memref<32x16xf32, #tpu.memory_space<vmem>>, %arg11: memref<2x8x32xf32, #tpu.memory_space<vmem>>, %arg12: memref<2x16xf32, #tpu.memory_space<vmem>>) attributes {dimension_semantics = [#tpu.dimension_semantics<arbitrary>], iteration_bounds = array<i64: 1>, scalar_prefetch = 1 : i64, scratch_operands = 0 : i64, tpu.core_type = #tpu.core_type<tc>, window_params = [{pipeline_mode = #tpu.pipeline_mode<synchronous>, transform_indices = @transform_0, window_bounds = array<i64: 2, 8, 32>}, {pipeline_mode = #tpu.pipeline_mode<synchronous>, transform_indices = @transform_1, window_bounds = array<i64: 2, 32, 96>}, {pipeline_mode = #tpu.pipeline_mode<synchronous>, transform_indices = @transform_2, window_bounds = array<i64: 2, 32, 32>}, {pipeline_mode = #tpu.pipeline_mode<synchronous>, transform_indices = @transform_3, window_bounds = array<i64: 2, 32, 128>}, {pipeline_mode = #tpu.pipeline_mode<synchronous>, transform_indices = @transform_4, window_bounds = array<i64: 2, 128, 32>}, {pipeline_mode = #tpu.pipeline_mode<synchronous>, transform_indices = @transform_5, window_bounds = array<i64: 2, 9, 32>}, {pipeline_mode = #tpu.pipeline_mode<synchronous>, transform_indices = @transform_6, window_bounds = array<i64: 2, 1, 128>}, {pipeline_mode = #tpu.pipeline_mode<synchronous>, transform_indices = @transform_7, window_bounds = array<i64: 2, 32>}, {pipeline_mode = #tpu.pipeline_mode<synchronous>, transform_indices = @transform_8, window_bounds = array<i64: 32, 16>}, {pipeline_mode = #tpu.pipeline_mode<synchronous>, transform_indices = @transform_9, window_bounds = array<i64: 2, 8, 32>}, {pipeline_mode = #tpu.pipeline_mode<synchronous>, transform_indices = @transform_10, window_bounds = array<i64: 2, 16>}]} {
    %c0 = arith.constant 0 : index
    %c0_0 = arith.constant 0 : index
    %c0_1 = arith.constant 0 : index
    %0 = vector.load %arg2[%c0, %c0_0, %c0_1] : memref<2x8x32xf32, #tpu.memory_space<vmem>>, vector<2x8x32xf32>
    %1 = vector.shape_cast %0 : vector<2x8x32xf32> to vector<16x32xf32>
    %2 = tpu.iota {dimensions = array<i32: 0>} : vector<8x8xi32>
    %3 = tpu.iota {dimensions = array<i32: 1>} : vector<8x8xi32>
    %4 = arith.cmpi sle, %3, %2 : vector<8x8xi32>
    %5 = vector.shape_cast %4 : vector<8x8xi1> to vector<1x8x8xi1>
    %c0_2 = arith.constant 0 : index
    %c0_3 = arith.constant 0 : index
    %c0_4 = arith.constant 0 : index
    %6 = vector.load %arg3[%c0_2, %c0_3, %c0_4] : memref<2x32x96xf32, #tpu.memory_space<vmem>>, vector<1x32x96xf32>
    %7 = vector.shape_cast %6 : vector<1x32x96xf32> to vector<32x96xf32>
    %c0_5 = arith.constant 0 : index
    %c0_6 = arith.constant 0 : index
    %c0_7 = arith.constant 0 : index
    %8 = vector.load %arg4[%c0_5, %c0_6, %c0_7] : memref<2x32x32xf32, #tpu.memory_space<vmem>>, vector<1x32x32xf32>
    %9 = vector.shape_cast %8 : vector<1x32x32xf32> to vector<32x32xf32>
    %c0_8 = arith.constant 0 : index
    %c0_9 = arith.constant 0 : index
    %c0_10 = arith.constant 0 : index
    %10 = vector.load %arg5[%c0_8, %c0_9, %c0_10] : memref<2x32x128xf32, #tpu.memory_space<vmem>>, vector<1x32x128xf32>
    %11 = vector.shape_cast %10 : vector<1x32x128xf32> to vector<32x128xf32>
    %c0_11 = arith.constant 0 : index
    %c0_12 = arith.constant 0 : index
    %c0_13 = arith.constant 0 : index
    %12 = vector.load %arg6[%c0_11, %c0_12, %c0_13] : memref<2x128x32xf32, #tpu.memory_space<vmem>>, vector<1x128x32xf32>
    %13 = vector.shape_cast %12 : vector<1x128x32xf32> to vector<128x32xf32>
    %c0_14 = arith.constant 0 : index
    %c0_15 = arith.constant 0 : index
    %c0_16 = arith.constant 0 : index
    %14 = vector.load %arg7[%c0_14, %c0_15, %c0_16] : memref<2x9x32xf32, #tpu.memory_space<vmem>>, vector<1x9x32xf32>
    %15 = vector.shape_cast %14 : vector<1x9x32xf32> to vector<9x32xf32>
    %c0_17 = arith.constant 0 : index
    %c0_18 = arith.constant 0 : index
    %c0_19 = arith.constant 0 : index
    %16 = vector.load %arg8[%c0_17, %c0_18, %c0_19] : memref<2x1x128xf32, #tpu.memory_space<vmem>>, vector<1x1x128xf32>
    %17 = vector.shape_cast %16 : vector<1x1x128xf32> to vector<1x128xf32>
    %18 = vector.extract_strided_slice %15 {offsets = [0, 0], sizes = [1, 32], strides = [1, 1]} : vector<9x32xf32> to vector<1x32xf32>
    %19 = vector.extract_strided_slice %15 {offsets = [1, 0], sizes = [1, 32], strides = [1, 1]} : vector<9x32xf32> to vector<1x32xf32>
    %20 = vector.extract_strided_slice %15 {offsets = [2, 0], sizes = [1, 32], strides = [1, 1]} : vector<9x32xf32> to vector<1x32xf32>
    %21 = vector.extract_strided_slice %15 {offsets = [3, 0], sizes = [1, 32], strides = [1, 1]} : vector<9x32xf32> to vector<1x32xf32>
    %22 = vector.extract_strided_slice %15 {offsets = [4, 0], sizes = [1, 32], strides = [1, 1]} : vector<9x32xf32> to vector<1x32xf32>
    %23 = vector.extract_strided_slice %15 {offsets = [5, 0], sizes = [1, 32], strides = [1, 1]} : vector<9x32xf32> to vector<1x32xf32>
    %24 = vector.extract_strided_slice %15 {offsets = [6, 0], sizes = [1, 32], strides = [1, 1]} : vector<9x32xf32> to vector<1x32xf32>
    %25 = vector.extract_strided_slice %15 {offsets = [7, 0], sizes = [1, 32], strides = [1, 1]} : vector<9x32xf32> to vector<1x32xf32>
    %26 = vector.extract_strided_slice %15 {offsets = [8, 0], sizes = [1, 32], strides = [1, 1]} : vector<9x32xf32> to vector<1x32xf32>
    %cst = arith.constant dense<0.000000e+00> : vector<16xf32>
    %27 = vector.multi_reduction <add>, %1, %cst [1] : vector<16x32xf32> to vector<16xf32>
    %28 = vector.shape_cast %27 : vector<16xf32> to vector<16x1xf32>
    %cst_20 = arith.constant 3.200000e+01 : f32
    %29 = vector.broadcast %cst_20 : f32 to vector<16x1xf32>
    %30 = arith.divf %28, %29 : vector<16x1xf32>
    %31 = vector.broadcast %30 : vector<16x1xf32> to vector<16x32xf32>
    %32 = arith.subf %1, %31 : vector<16x32xf32>
    %33 = arith.mulf %32, %32 : vector<16x32xf32>
    %cst_21 = arith.constant dense<0.000000e+00> : vector<16xf32>
    %34 = vector.multi_reduction <add>, %33, %cst_21 [1] : vector<16x32xf32> to vector<16xf32>
    %35 = vector.shape_cast %34 : vector<16xf32> to vector<16x1xf32>
    %cst_22 = arith.constant 3.200000e+01 : f32
    %36 = vector.broadcast %cst_22 : f32 to vector<16x1xf32>
    %37 = arith.divf %35, %36 : vector<16x1xf32>
    %38 = vector.broadcast %30 : vector<16x1xf32> to vector<16x32xf32>
    %39 = arith.subf %1, %38 : vector<16x32xf32>
    %cst_23 = arith.constant 9.99999974E-6 : f32
    %40 = vector.broadcast %cst_23 : f32 to vector<16x1xf32>
    %41 = arith.addf %37, %40 : vector<16x1xf32>
    %42 = math.rsqrt %41 : vector<16x1xf32>
    %43 = vector.broadcast %42 : vector<16x1xf32> to vector<16x32xf32>
    %44 = arith.mulf %39, %43 : vector<16x32xf32>
    %45 = vector.broadcast %18 : vector<1x32xf32> to vector<16x32xf32>
    %46 = arith.mulf %44, %45 : vector<16x32xf32>
    %47 = vector.broadcast %19 : vector<1x32xf32> to vector<16x32xf32>
    %48 = arith.addf %46, %47 : vector<16x32xf32>
    %cst_24 = arith.constant dense<0.000000e+00> : vector<16x96xf32>
    %49 = tpu.matmul %48, %7, %cst_24 {dimension_numbers = #tpu.dot_dimension_numbers<[1], [0], [0], [1], [0, 0, 1, 1], [], []>} : vector<16x32xf32>, vector<32x96xf32>, vector<16x96xf32> -> vector<16x96xf32>
    %50 = vector.extract_strided_slice %49 {offsets = [0, 0], sizes = [16, 32], strides = [1, 1]} : vector<16x96xf32> to vector<16x32xf32>
    %51 = vector.broadcast %20 : vector<1x32xf32> to vector<16x32xf32>
    %52 = arith.addf %50, %51 : vector<16x32xf32>
    %53 = vector.shape_cast %52 : vector<16x32xf32> to vector<2x8x32xf32>
    %54 = vector.extract_strided_slice %49 {offsets = [0, 32], sizes = [16, 32], strides = [1, 1]} : vector<16x96xf32> to vector<16x32xf32>
    %55 = vector.broadcast %21 : vector<1x32xf32> to vector<16x32xf32>
    %56 = arith.addf %54, %55 : vector<16x32xf32>
    %57 = vector.shape_cast %56 : vector<16x32xf32> to vector<2x8x32xf32>
    %58 = vector.extract_strided_slice %49 {offsets = [0, 64], sizes = [16, 32], strides = [1, 1]} : vector<16x96xf32> to vector<16x32xf32>
    %59 = vector.broadcast %22 : vector<1x32xf32> to vector<16x32xf32>
    %60 = arith.addf %58, %59 : vector<16x32xf32>
    %61 = vector.shape_cast %60 : vector<16x32xf32> to vector<2x8x32xf32>
    %62 = vector.extract_strided_slice %53 {offsets = [0, 0, 0], sizes = [2, 8, 8], strides = [1, 1, 1]} : vector<2x8x32xf32> to vector<2x8x8xf32>
    %63 = vector.extract_strided_slice %57 {offsets = [0, 0, 0], sizes = [2, 8, 8], strides = [1, 1, 1]} : vector<2x8x32xf32> to vector<2x8x8xf32>
    %64 = vector.extract_strided_slice %61 {offsets = [0, 0, 0], sizes = [2, 8, 8], strides = [1, 1, 1]} : vector<2x8x32xf32> to vector<2x8x8xf32>
    "tpu.trace_start"() <{level = 10 : i32, message = "bqd,bkd->bqk"}> : () -> ()
    %cst_25 = arith.constant dense<0.000000e+00> : vector<2x8x8xf32>
    %65 = tpu.matmul %62, %63, %cst_25 {dimension_numbers = #tpu.dot_dimension_numbers<[2], [2], [1], [1], [0, 0, 0, 1, 1, 1], [0], [0]>} : vector<2x8x8xf32>, vector<2x8x8xf32>, vector<2x8x8xf32> -> vector<2x8x8xf32>
    "tpu.trace_stop"() : () -> ()
    %cst_26 = arith.constant 0.353553385 : f32
    %66 = vector.broadcast %cst_26 : f32 to vector<2x8x8xf32>
    %67 = arith.mulf %65, %66 : vector<2x8x8xf32>
    %cst_27 = arith.constant -1.000000e+30 : f32
    %68 = vector.shape_cast %5 : vector<1x8x8xi1> to vector<1x8x8xi1>
    %69 = vector.broadcast %68 : vector<1x8x8xi1> to vector<2x8x8xi1>
    %70 = vector.broadcast %cst_27 : f32 to vector<2x8x8xf32>
    %71 = arith.select %69, %67, %70 : vector<2x8x8xi1>, vector<2x8x8xf32>
    %cst_28 = arith.constant dense<0xFF800000> : vector<2x8xf32>
    %72 = vector.multi_reduction <maximumf>, %71, %cst_28 [2] : vector<2x8x8xf32> to vector<2x8xf32>
    %73 = vector.shape_cast %72 : vector<2x8xf32> to vector<2x8x1xf32>
    %74 = vector.broadcast %73 : vector<2x8x1xf32> to vector<2x8x8xf32>
    %75 = arith.subf %71, %74 : vector<2x8x8xf32>
    %76 = math.exp %75 : vector<2x8x8xf32>
    %cst_29 = arith.constant dense<0.000000e+00> : vector<2x8xf32>
    %77 = vector.multi_reduction <add>, %76, %cst_29 [2] : vector<2x8x8xf32> to vector<2x8xf32>
    %78 = vector.shape_cast %77 : vector<2x8xf32> to vector<2x8x1xf32>
    %79 = tpu.reciprocal %78 {approx = true} : vector<2x8x1xf32> -> vector<2x8x1xf32>
    %80 = vector.broadcast %79 : vector<2x8x1xf32> to vector<2x8x8xf32>
    %81 = arith.mulf %76, %80 : vector<2x8x8xf32>
    "tpu.trace_start"() <{level = 10 : i32, message = "bqk,bkd->bqd"}> : () -> ()
    %cst_30 = arith.constant dense<0.000000e+00> : vector<2x8x8xf32>
    %82 = tpu.matmul %81, %64, %cst_30 {dimension_numbers = #tpu.dot_dimension_numbers<[2], [1], [1], [2], [0, 0, 0, 1, 1, 2], [0], [0]>} : vector<2x8x8xf32>, vector<2x8x8xf32>, vector<2x8x8xf32> -> vector<2x8x8xf32>
    "tpu.trace_stop"() : () -> ()
    %83 = vector.extract_strided_slice %53 {offsets = [0, 0, 8], sizes = [2, 8, 8], strides = [1, 1, 1]} : vector<2x8x32xf32> to vector<2x8x8xf32>
    %84 = vector.extract_strided_slice %57 {offsets = [0, 0, 8], sizes = [2, 8, 8], strides = [1, 1, 1]} : vector<2x8x32xf32> to vector<2x8x8xf32>
    %85 = vector.extract_strided_slice %61 {offsets = [0, 0, 8], sizes = [2, 8, 8], strides = [1, 1, 1]} : vector<2x8x32xf32> to vector<2x8x8xf32>
    "tpu.trace_start"() <{level = 10 : i32, message = "bqd,bkd->bqk"}> : () -> ()
    %cst_31 = arith.constant dense<0.000000e+00> : vector<2x8x8xf32>
    %86 = tpu.matmul %83, %84, %cst_31 {dimension_numbers = #tpu.dot_dimension_numbers<[2], [2], [1], [1], [0, 0, 0, 1, 1, 1], [0], [0]>} : vector<2x8x8xf32>, vector<2x8x8xf32>, vector<2x8x8xf32> -> vector<2x8x8xf32>
    "tpu.trace_stop"() : () -> ()
    %cst_32 = arith.constant 0.353553385 : f32
    %87 = vector.broadcast %cst_32 : f32 to vector<2x8x8xf32>
    %88 = arith.mulf %86, %87 : vector<2x8x8xf32>
    %cst_33 = arith.constant -1.000000e+30 : f32
    %89 = vector.shape_cast %5 : vector<1x8x8xi1> to vector<1x8x8xi1>
    %90 = vector.broadcast %89 : vector<1x8x8xi1> to vector<2x8x8xi1>
    %91 = vector.broadcast %cst_33 : f32 to vector<2x8x8xf32>
    %92 = arith.select %90, %88, %91 : vector<2x8x8xi1>, vector<2x8x8xf32>
    %cst_34 = arith.constant dense<0xFF800000> : vector<2x8xf32>
    %93 = vector.multi_reduction <maximumf>, %92, %cst_34 [2] : vector<2x8x8xf32> to vector<2x8xf32>
    %94 = vector.shape_cast %93 : vector<2x8xf32> to vector<2x8x1xf32>
    %95 = vector.broadcast %94 : vector<2x8x1xf32> to vector<2x8x8xf32>
    %96 = arith.subf %92, %95 : vector<2x8x8xf32>
    %97 = math.exp %96 : vector<2x8x8xf32>
    %cst_35 = arith.constant dense<0.000000e+00> : vector<2x8xf32>
    %98 = vector.multi_reduction <add>, %97, %cst_35 [2] : vector<2x8x8xf32> to vector<2x8xf32>
    %99 = vector.shape_cast %98 : vector<2x8xf32> to vector<2x8x1xf32>
    %100 = tpu.reciprocal %99 {approx = true} : vector<2x8x1xf32> -> vector<2x8x1xf32>
    %101 = vector.broadcast %100 : vector<2x8x1xf32> to vector<2x8x8xf32>
    %102 = arith.mulf %97, %101 : vector<2x8x8xf32>
    "tpu.trace_start"() <{level = 10 : i32, message = "bqk,bkd->bqd"}> : () -> ()
    %cst_36 = arith.constant dense<0.000000e+00> : vector<2x8x8xf32>
    %103 = tpu.matmul %102, %85, %cst_36 {dimension_numbers = #tpu.dot_dimension_numbers<[2], [1], [1], [2], [0, 0, 0, 1, 1, 2], [0], [0]>} : vector<2x8x8xf32>, vector<2x8x8xf32>, vector<2x8x8xf32> -> vector<2x8x8xf32>
    "tpu.trace_stop"() : () -> ()
    %104 = vector.extract_strided_slice %53 {offsets = [0, 0, 16], sizes = [2, 8, 8], strides = [1, 1, 1]} : vector<2x8x32xf32> to vector<2x8x8xf32>
    %105 = vector.extract_strided_slice %57 {offsets = [0, 0, 16], sizes = [2, 8, 8], strides = [1, 1, 1]} : vector<2x8x32xf32> to vector<2x8x8xf32>
    %106 = vector.extract_strided_slice %61 {offsets = [0, 0, 16], sizes = [2, 8, 8], strides = [1, 1, 1]} : vector<2x8x32xf32> to vector<2x8x8xf32>
    "tpu.trace_start"() <{level = 10 : i32, message = "bqd,bkd->bqk"}> : () -> ()
    %cst_37 = arith.constant dense<0.000000e+00> : vector<2x8x8xf32>
    %107 = tpu.matmul %104, %105, %cst_37 {dimension_numbers = #tpu.dot_dimension_numbers<[2], [2], [1], [1], [0, 0, 0, 1, 1, 1], [0], [0]>} : vector<2x8x8xf32>, vector<2x8x8xf32>, vector<2x8x8xf32> -> vector<2x8x8xf32>
    "tpu.trace_stop"() : () -> ()
    %cst_38 = arith.constant 0.353553385 : f32
    %108 = vector.broadcast %cst_38 : f32 to vector<2x8x8xf32>
    %109 = arith.mulf %107, %108 : vector<2x8x8xf32>
    %cst_39 = arith.constant -1.000000e+30 : f32
    %110 = vector.shape_cast %5 : vector<1x8x8xi1> to vector<1x8x8xi1>
    %111 = vector.broadcast %110 : vector<1x8x8xi1> to vector<2x8x8xi1>
    %112 = vector.broadcast %cst_39 : f32 to vector<2x8x8xf32>
    %113 = arith.select %111, %109, %112 : vector<2x8x8xi1>, vector<2x8x8xf32>
    %cst_40 = arith.constant dense<0xFF800000> : vector<2x8xf32>
    %114 = vector.multi_reduction <maximumf>, %113, %cst_40 [2] : vector<2x8x8xf32> to vector<2x8xf32>
    %115 = vector.shape_cast %114 : vector<2x8xf32> to vector<2x8x1xf32>
    %116 = vector.broadcast %115 : vector<2x8x1xf32> to vector<2x8x8xf32>
    %117 = arith.subf %113, %116 : vector<2x8x8xf32>
    %118 = math.exp %117 : vector<2x8x8xf32>
    %cst_41 = arith.constant dense<0.000000e+00> : vector<2x8xf32>
    %119 = vector.multi_reduction <add>, %118, %cst_41 [2] : vector<2x8x8xf32> to vector<2x8xf32>
    %120 = vector.shape_cast %119 : vector<2x8xf32> to vector<2x8x1xf32>
    %121 = tpu.reciprocal %120 {approx = true} : vector<2x8x1xf32> -> vector<2x8x1xf32>
    %122 = vector.broadcast %121 : vector<2x8x1xf32> to vector<2x8x8xf32>
    %123 = arith.mulf %118, %122 : vector<2x8x8xf32>
    "tpu.trace_start"() <{level = 10 : i32, message = "bqk,bkd->bqd"}> : () -> ()
    %cst_42 = arith.constant dense<0.000000e+00> : vector<2x8x8xf32>
    %124 = tpu.matmul %123, %106, %cst_42 {dimension_numbers = #tpu.dot_dimension_numbers<[2], [1], [1], [2], [0, 0, 0, 1, 1, 2], [0], [0]>} : vector<2x8x8xf32>, vector<2x8x8xf32>, vector<2x8x8xf32> -> vector<2x8x8xf32>
    "tpu.trace_stop"() : () -> ()
    %125 = vector.extract_strided_slice %53 {offsets = [0, 0, 24], sizes = [2, 8, 8], strides = [1, 1, 1]} : vector<2x8x32xf32> to vector<2x8x8xf32>
    %126 = vector.extract_strided_slice %57 {offsets = [0, 0, 24], sizes = [2, 8, 8], strides = [1, 1, 1]} : vector<2x8x32xf32> to vector<2x8x8xf32>
    %127 = vector.extract_strided_slice %61 {offsets = [0, 0, 24], sizes = [2, 8, 8], strides = [1, 1, 1]} : vector<2x8x32xf32> to vector<2x8x8xf32>
    "tpu.trace_start"() <{level = 10 : i32, message = "bqd,bkd->bqk"}> : () -> ()
    %cst_43 = arith.constant dense<0.000000e+00> : vector<2x8x8xf32>
    %128 = tpu.matmul %125, %126, %cst_43 {dimension_numbers = #tpu.dot_dimension_numbers<[2], [2], [1], [1], [0, 0, 0, 1, 1, 1], [0], [0]>} : vector<2x8x8xf32>, vector<2x8x8xf32>, vector<2x8x8xf32> -> vector<2x8x8xf32>
    "tpu.trace_stop"() : () -> ()
    %cst_44 = arith.constant 0.353553385 : f32
    %129 = vector.broadcast %cst_44 : f32 to vector<2x8x8xf32>
    %130 = arith.mulf %128, %129 : vector<2x8x8xf32>
    %cst_45 = arith.constant -1.000000e+30 : f32
    %131 = vector.shape_cast %5 : vector<1x8x8xi1> to vector<1x8x8xi1>
    %132 = vector.broadcast %131 : vector<1x8x8xi1> to vector<2x8x8xi1>
    %133 = vector.broadcast %cst_45 : f32 to vector<2x8x8xf32>
    %134 = arith.select %132, %130, %133 : vector<2x8x8xi1>, vector<2x8x8xf32>
    %cst_46 = arith.constant dense<0xFF800000> : vector<2x8xf32>
    %135 = vector.multi_reduction <maximumf>, %134, %cst_46 [2] : vector<2x8x8xf32> to vector<2x8xf32>
    %136 = vector.shape_cast %135 : vector<2x8xf32> to vector<2x8x1xf32>
    %137 = vector.broadcast %136 : vector<2x8x1xf32> to vector<2x8x8xf32>
    %138 = arith.subf %134, %137 : vector<2x8x8xf32>
    %139 = math.exp %138 : vector<2x8x8xf32>
    %cst_47 = arith.constant dense<0.000000e+00> : vector<2x8xf32>
    %140 = vector.multi_reduction <add>, %139, %cst_47 [2] : vector<2x8x8xf32> to vector<2x8xf32>
    %141 = vector.shape_cast %140 : vector<2x8xf32> to vector<2x8x1xf32>
    %142 = tpu.reciprocal %141 {approx = true} : vector<2x8x1xf32> -> vector<2x8x1xf32>
    %143 = vector.broadcast %142 : vector<2x8x1xf32> to vector<2x8x8xf32>
    %144 = arith.mulf %139, %143 : vector<2x8x8xf32>
    "tpu.trace_start"() <{level = 10 : i32, message = "bqk,bkd->bqd"}> : () -> ()
    %cst_48 = arith.constant dense<0.000000e+00> : vector<2x8x8xf32>
    %145 = tpu.matmul %144, %127, %cst_48 {dimension_numbers = #tpu.dot_dimension_numbers<[2], [1], [1], [2], [0, 0, 0, 1, 1, 2], [0], [0]>} : vector<2x8x8xf32>, vector<2x8x8xf32>, vector<2x8x8xf32> -> vector<2x8x8xf32>
    "tpu.trace_stop"() : () -> ()
    %146 = tpu.concatenate %82, %103, %124, %145 in 2 : vector<2x8x8xf32>, vector<2x8x8xf32>, vector<2x8x8xf32>, vector<2x8x8xf32> -> vector<2x8x32xf32>
    %147 = vector.shape_cast %146 : vector<2x8x32xf32> to vector<16x32xf32>
    %cst_49 = arith.constant dense<0.000000e+00> : vector<16x32xf32>
    %148 = tpu.matmul %147, %9, %cst_49 {dimension_numbers = #tpu.dot_dimension_numbers<[1], [0], [0], [1], [0, 0, 1, 1], [], []>} : vector<16x32xf32>, vector<32x32xf32>, vector<16x32xf32> -> vector<16x32xf32>
    %149 = arith.addf %1, %148 : vector<16x32xf32>
    %150 = vector.broadcast %23 : vector<1x32xf32> to vector<16x32xf32>
    %151 = arith.addf %149, %150 : vector<16x32xf32>
    %cst_50 = arith.constant dense<0.000000e+00> : vector<16xf32>
    %152 = vector.multi_reduction <add>, %151, %cst_50 [1] : vector<16x32xf32> to vector<16xf32>
    %153 = vector.shape_cast %152 : vector<16xf32> to vector<16x1xf32>
    %cst_51 = arith.constant 3.200000e+01 : f32
    %154 = vector.broadcast %cst_51 : f32 to vector<16x1xf32>
    %155 = arith.divf %153, %154 : vector<16x1xf32>
    %156 = vector.broadcast %155 : vector<16x1xf32> to vector<16x32xf32>
    %157 = arith.subf %151, %156 : vector<16x32xf32>
    %158 = arith.mulf %157, %157 : vector<16x32xf32>
    %cst_52 = arith.constant dense<0.000000e+00> : vector<16xf32>
    %159 = vector.multi_reduction <add>, %158, %cst_52 [1] : vector<16x32xf32> to vector<16xf32>
    %160 = vector.shape_cast %159 : vector<16xf32> to vector<16x1xf32>
    %cst_53 = arith.constant 3.200000e+01 : f32
    %161 = vector.broadcast %cst_53 : f32 to vector<16x1xf32>
    %162 = arith.divf %160, %161 : vector<16x1xf32>
    %163 = vector.broadcast %155 : vector<16x1xf32> to vector<16x32xf32>
    %164 = arith.subf %151, %163 : vector<16x32xf32>
    %cst_54 = arith.constant 9.99999974E-6 : f32
    %165 = vector.broadcast %cst_54 : f32 to vector<16x1xf32>
    %166 = arith.addf %162, %165 : vector<16x1xf32>
    %167 = math.rsqrt %166 : vector<16x1xf32>
    %168 = vector.broadcast %167 : vector<16x1xf32> to vector<16x32xf32>
    %169 = arith.mulf %164, %168 : vector<16x32xf32>
    %170 = vector.broadcast %24 : vector<1x32xf32> to vector<16x32xf32>
    %171 = arith.mulf %169, %170 : vector<16x32xf32>
    %172 = vector.broadcast %25 : vector<1x32xf32> to vector<16x32xf32>
    %173 = arith.addf %171, %172 : vector<16x32xf32>
    %cst_55 = arith.constant dense<0.000000e+00> : vector<16x128xf32>
    %174 = tpu.matmul %173, %11, %cst_55 {dimension_numbers = #tpu.dot_dimension_numbers<[1], [0], [0], [1], [0, 0, 1, 1], [], []>} : vector<16x32xf32>, vector<32x128xf32>, vector<16x128xf32> -> vector<16x128xf32>
    %175 = vector.broadcast %17 : vector<1x128xf32> to vector<16x128xf32>
    %176 = arith.addf %174, %175 : vector<16x128xf32>
    %cst_56 = arith.constant 1.702000e+00 : f32
    %177 = vector.broadcast %cst_56 : f32 to vector<16x128xf32>
    %178 = arith.mulf %177, %176 : vector<16x128xf32>
    %179 = arith.negf %178 : vector<16x128xf32>
    %180 = math.exp %179 : vector<16x128xf32>
    %cst_57 = arith.constant 1.000000e+00 : f32
    %181 = vector.broadcast %cst_57 : f32 to vector<16x128xf32>
    %182 = arith.addf %181, %180 : vector<16x128xf32>
    %183 = arith.divf %181, %182 : vector<16x128xf32>
    %184 = arith.mulf %176, %183 : vector<16x128xf32>
    %cst_58 = arith.constant dense<0.000000e+00> : vector<16x32xf32>
    %185 = tpu.matmul %184, %13, %cst_58 {dimension_numbers = #tpu.dot_dimension_numbers<[1], [0], [0], [1], [0, 0, 1, 1], [], []>} : vector<16x128xf32>, vector<128x32xf32>, vector<16x32xf32> -> vector<16x32xf32>
    %186 = arith.addf %151, %185 : vector<16x32xf32>
    %187 = vector.broadcast %26 : vector<1x32xf32> to vector<16x32xf32>
    %188 = arith.addf %186, %187 : vector<16x32xf32>
    %c1 = arith.constant 1 : index
    %c0_59 = arith.constant 0 : index
    %c0_60 = arith.constant 0 : index
    %189 = vector.load %arg3[%c1, %c0_59, %c0_60] : memref<2x32x96xf32, #tpu.memory_space<vmem>>, vector<1x32x96xf32>
    %190 = vector.shape_cast %189 : vector<1x32x96xf32> to vector<32x96xf32>
    %c1_61 = arith.constant 1 : index
    %c0_62 = arith.constant 0 : index
    %c0_63 = arith.constant 0 : index
    %191 = vector.load %arg4[%c1_61, %c0_62, %c0_63] : memref<2x32x32xf32, #tpu.memory_space<vmem>>, vector<1x32x32xf32>
    %192 = vector.shape_cast %191 : vector<1x32x32xf32> to vector<32x32xf32>
    %c1_64 = arith.constant 1 : index
    %c0_65 = arith.constant 0 : index
    %c0_66 = arith.constant 0 : index
    %193 = vector.load %arg5[%c1_64, %c0_65, %c0_66] : memref<2x32x128xf32, #tpu.memory_space<vmem>>, vector<1x32x128xf32>
    %194 = vector.shape_cast %193 : vector<1x32x128xf32> to vector<32x128xf32>
    %c1_67 = arith.constant 1 : index
    %c0_68 = arith.constant 0 : index
    %c0_69 = arith.constant 0 : index
    %195 = vector.load %arg6[%c1_67, %c0_68, %c0_69] : memref<2x128x32xf32, #tpu.memory_space<vmem>>, vector<1x128x32xf32>
    %196 = vector.shape_cast %195 : vector<1x128x32xf32> to vector<128x32xf32>
    %c1_70 = arith.constant 1 : index
    %c0_71 = arith.constant 0 : index
    %c0_72 = arith.constant 0 : index
    %197 = vector.load %arg7[%c1_70, %c0_71, %c0_72] : memref<2x9x32xf32, #tpu.memory_space<vmem>>, vector<1x9x32xf32>
    %198 = vector.shape_cast %197 : vector<1x9x32xf32> to vector<9x32xf32>
    %c1_73 = arith.constant 1 : index
    %c0_74 = arith.constant 0 : index
    %c0_75 = arith.constant 0 : index
    %199 = vector.load %arg8[%c1_73, %c0_74, %c0_75] : memref<2x1x128xf32, #tpu.memory_space<vmem>>, vector<1x1x128xf32>
    %200 = vector.shape_cast %199 : vector<1x1x128xf32> to vector<1x128xf32>
    %201 = vector.extract_strided_slice %198 {offsets = [0, 0], sizes = [1, 32], strides = [1, 1]} : vector<9x32xf32> to vector<1x32xf32>
    %202 = vector.extract_strided_slice %198 {offsets = [1, 0], sizes = [1, 32], strides = [1, 1]} : vector<9x32xf32> to vector<1x32xf32>
    %203 = vector.extract_strided_slice %198 {offsets = [2, 0], sizes = [1, 32], strides = [1, 1]} : vector<9x32xf32> to vector<1x32xf32>
    %204 = vector.extract_strided_slice %198 {offsets = [3, 0], sizes = [1, 32], strides = [1, 1]} : vector<9x32xf32> to vector<1x32xf32>
    %205 = vector.extract_strided_slice %198 {offsets = [4, 0], sizes = [1, 32], strides = [1, 1]} : vector<9x32xf32> to vector<1x32xf32>
    %206 = vector.extract_strided_slice %198 {offsets = [5, 0], sizes = [1, 32], strides = [1, 1]} : vector<9x32xf32> to vector<1x32xf32>
    %207 = vector.extract_strided_slice %198 {offsets = [6, 0], sizes = [1, 32], strides = [1, 1]} : vector<9x32xf32> to vector<1x32xf32>
    %208 = vector.extract_strided_slice %198 {offsets = [7, 0], sizes = [1, 32], strides = [1, 1]} : vector<9x32xf32> to vector<1x32xf32>
    %209 = vector.extract_strided_slice %198 {offsets = [8, 0], sizes = [1, 32], strides = [1, 1]} : vector<9x32xf32> to vector<1x32xf32>
    %cst_76 = arith.constant dense<0.000000e+00> : vector<16xf32>
    %210 = vector.multi_reduction <add>, %188, %cst_76 [1] : vector<16x32xf32> to vector<16xf32>
    %211 = vector.shape_cast %210 : vector<16xf32> to vector<16x1xf32>
    %cst_77 = arith.constant 3.200000e+01 : f32
    %212 = vector.broadcast %cst_77 : f32 to vector<16x1xf32>
    %213 = arith.divf %211, %212 : vector<16x1xf32>
    %214 = vector.broadcast %213 : vector<16x1xf32> to vector<16x32xf32>
    %215 = arith.subf %188, %214 : vector<16x32xf32>
    %216 = arith.mulf %215, %215 : vector<16x32xf32>
    %cst_78 = arith.constant dense<0.000000e+00> : vector<16xf32>
    %217 = vector.multi_reduction <add>, %216, %cst_78 [1] : vector<16x32xf32> to vector<16xf32>
    %218 = vector.shape_cast %217 : vector<16xf32> to vector<16x1xf32>
    %cst_79 = arith.constant 3.200000e+01 : f32
    %219 = vector.broadcast %cst_79 : f32 to vector<16x1xf32>
    %220 = arith.divf %218, %219 : vector<16x1xf32>
    %221 = vector.broadcast %213 : vector<16x1xf32> to vector<16x32xf32>
    %222 = arith.subf %188, %221 : vector<16x32xf32>
    %cst_80 = arith.constant 9.99999974E-6 : f32
    %223 = vector.broadcast %cst_80 : f32 to vector<16x1xf32>
    %224 = arith.addf %220, %223 : vector<16x1xf32>
    %225 = math.rsqrt %224 : vector<16x1xf32>
    %226 = vector.broadcast %225 : vector<16x1xf32> to vector<16x32xf32>
    %227 = arith.mulf %222, %226 : vector<16x32xf32>
    %228 = vector.broadcast %201 : vector<1x32xf32> to vector<16x32xf32>
    %229 = arith.mulf %227, %228 : vector<16x32xf32>
    %230 = vector.broadcast %202 : vector<1x32xf32> to vector<16x32xf32>
    %231 = arith.addf %229, %230 : vector<16x32xf32>
    %cst_81 = arith.constant dense<0.000000e+00> : vector<16x96xf32>
    %232 = tpu.matmul %231, %190, %cst_81 {dimension_numbers = #tpu.dot_dimension_numbers<[1], [0], [0], [1], [0, 0, 1, 1], [], []>} : vector<16x32xf32>, vector<32x96xf32>, vector<16x96xf32> -> vector<16x96xf32>
    %233 = vector.extract_strided_slice %232 {offsets = [0, 0], sizes = [16, 32], strides = [1, 1]} : vector<16x96xf32> to vector<16x32xf32>
    %234 = vector.broadcast %203 : vector<1x32xf32> to vector<16x32xf32>
    %235 = arith.addf %233, %234 : vector<16x32xf32>
    %236 = vector.shape_cast %235 : vector<16x32xf32> to vector<2x8x32xf32>
    %237 = vector.extract_strided_slice %232 {offsets = [0, 32], sizes = [16, 32], strides = [1, 1]} : vector<16x96xf32> to vector<16x32xf32>
    %238 = vector.broadcast %204 : vector<1x32xf32> to vector<16x32xf32>
    %239 = arith.addf %237, %238 : vector<16x32xf32>
    %240 = vector.shape_cast %239 : vector<16x32xf32> to vector<2x8x32xf32>
    %241 = vector.extract_strided_slice %232 {offsets = [0, 64], sizes = [16, 32], strides = [1, 1]} : vector<16x96xf32> to vector<16x32xf32>
    %242 = vector.broadcast %205 : vector<1x32xf32> to vector<16x32xf32>
    %243 = arith.addf %241, %242 : vector<16x32xf32>
    %244 = vector.shape_cast %243 : vector<16x32xf32> to vector<2x8x32xf32>
    %245 = vector.extract_strided_slice %236 {offsets = [0, 0, 0], sizes = [2, 8, 8], strides = [1, 1, 1]} : vector<2x8x32xf32> to vector<2x8x8xf32>
    %246 = vector.extract_strided_slice %240 {offsets = [0, 0, 0], sizes = [2, 8, 8], strides = [1, 1, 1]} : vector<2x8x32xf32> to vector<2x8x8xf32>
    %247 = vector.extract_strided_slice %244 {offsets = [0, 0, 0], sizes = [2, 8, 8], strides = [1, 1, 1]} : vector<2x8x32xf32> to vector<2x8x8xf32>
    "tpu.trace_start"() <{level = 10 : i32, message = "bqd,bkd->bqk"}> : () -> ()
    %cst_82 = arith.constant dense<0.000000e+00> : vector<2x8x8xf32>
    %248 = tpu.matmul %245, %246, %cst_82 {dimension_numbers = #tpu.dot_dimension_numbers<[2], [2], [1], [1], [0, 0, 0, 1, 1, 1], [0], [0]>} : vector<2x8x8xf32>, vector<2x8x8xf32>, vector<2x8x8xf32> -> vector<2x8x8xf32>
    "tpu.trace_stop"() : () -> ()
    %cst_83 = arith.constant 0.353553385 : f32
    %249 = vector.broadcast %cst_83 : f32 to vector<2x8x8xf32>
    %250 = arith.mulf %248, %249 : vector<2x8x8xf32>
    %cst_84 = arith.constant -1.000000e+30 : f32
    %251 = vector.shape_cast %5 : vector<1x8x8xi1> to vector<1x8x8xi1>
    %252 = vector.broadcast %251 : vector<1x8x8xi1> to vector<2x8x8xi1>
    %253 = vector.broadcast %cst_84 : f32 to vector<2x8x8xf32>
    %254 = arith.select %252, %250, %253 : vector<2x8x8xi1>, vector<2x8x8xf32>
    %cst_85 = arith.constant dense<0xFF800000> : vector<2x8xf32>
    %255 = vector.multi_reduction <maximumf>, %254, %cst_85 [2] : vector<2x8x8xf32> to vector<2x8xf32>
    %256 = vector.shape_cast %255 : vector<2x8xf32> to vector<2x8x1xf32>
    %257 = vector.broadcast %256 : vector<2x8x1xf32> to vector<2x8x8xf32>
    %258 = arith.subf %254, %257 : vector<2x8x8xf32>
    %259 = math.exp %258 : vector<2x8x8xf32>
    %cst_86 = arith.constant dense<0.000000e+00> : vector<2x8xf32>
    %260 = vector.multi_reduction <add>, %259, %cst_86 [2] : vector<2x8x8xf32> to vector<2x8xf32>
    %261 = vector.shape_cast %260 : vector<2x8xf32> to vector<2x8x1xf32>
    %262 = tpu.reciprocal %261 {approx = true} : vector<2x8x1xf32> -> vector<2x8x1xf32>
    %263 = vector.broadcast %262 : vector<2x8x1xf32> to vector<2x8x8xf32>
    %264 = arith.mulf %259, %263 : vector<2x8x8xf32>
    "tpu.trace_start"() <{level = 10 : i32, message = "bqk,bkd->bqd"}> : () -> ()
    %cst_87 = arith.constant dense<0.000000e+00> : vector<2x8x8xf32>
    %265 = tpu.matmul %264, %247, %cst_87 {dimension_numbers = #tpu.dot_dimension_numbers<[2], [1], [1], [2], [0, 0, 0, 1, 1, 2], [0], [0]>} : vector<2x8x8xf32>, vector<2x8x8xf32>, vector<2x8x8xf32> -> vector<2x8x8xf32>
    "tpu.trace_stop"() : () -> ()
    %266 = vector.extract_strided_slice %236 {offsets = [0, 0, 8], sizes = [2, 8, 8], strides = [1, 1, 1]} : vector<2x8x32xf32> to vector<2x8x8xf32>
    %267 = vector.extract_strided_slice %240 {offsets = [0, 0, 8], sizes = [2, 8, 8], strides = [1, 1, 1]} : vector<2x8x32xf32> to vector<2x8x8xf32>
    %268 = vector.extract_strided_slice %244 {offsets = [0, 0, 8], sizes = [2, 8, 8], strides = [1, 1, 1]} : vector<2x8x32xf32> to vector<2x8x8xf32>
    "tpu.trace_start"() <{level = 10 : i32, message = "bqd,bkd->bqk"}> : () -> ()
    %cst_88 = arith.constant dense<0.000000e+00> : vector<2x8x8xf32>
    %269 = tpu.matmul %266, %267, %cst_88 {dimension_numbers = #tpu.dot_dimension_numbers<[2], [2], [1], [1], [0, 0, 0, 1, 1, 1], [0], [0]>} : vector<2x8x8xf32>, vector<2x8x8xf32>, vector<2x8x8xf32> -> vector<2x8x8xf32>
    "tpu.trace_stop"() : () -> ()
    %cst_89 = arith.constant 0.353553385 : f32
    %270 = vector.broadcast %cst_89 : f32 to vector<2x8x8xf32>
    %271 = arith.mulf %269, %270 : vector<2x8x8xf32>
    %cst_90 = arith.constant -1.000000e+30 : f32
    %272 = vector.shape_cast %5 : vector<1x8x8xi1> to vector<1x8x8xi1>
    %273 = vector.broadcast %272 : vector<1x8x8xi1> to vector<2x8x8xi1>
    %274 = vector.broadcast %cst_90 : f32 to vector<2x8x8xf32>
    %275 = arith.select %273, %271, %274 : vector<2x8x8xi1>, vector<2x8x8xf32>
    %cst_91 = arith.constant dense<0xFF800000> : vector<2x8xf32>
    %276 = vector.multi_reduction <maximumf>, %275, %cst_91 [2] : vector<2x8x8xf32> to vector<2x8xf32>
    %277 = vector.shape_cast %276 : vector<2x8xf32> to vector<2x8x1xf32>
    %278 = vector.broadcast %277 : vector<2x8x1xf32> to vector<2x8x8xf32>
    %279 = arith.subf %275, %278 : vector<2x8x8xf32>
    %280 = math.exp %279 : vector<2x8x8xf32>
    %cst_92 = arith.constant dense<0.000000e+00> : vector<2x8xf32>
    %281 = vector.multi_reduction <add>, %280, %cst_92 [2] : vector<2x8x8xf32> to vector<2x8xf32>
    %282 = vector.shape_cast %281 : vector<2x8xf32> to vector<2x8x1xf32>
    %283 = tpu.reciprocal %282 {approx = true} : vector<2x8x1xf32> -> vector<2x8x1xf32>
    %284 = vector.broadcast %283 : vector<2x8x1xf32> to vector<2x8x8xf32>
    %285 = arith.mulf %280, %284 : vector<2x8x8xf32>
    "tpu.trace_start"() <{level = 10 : i32, message = "bqk,bkd->bqd"}> : () -> ()
    %cst_93 = arith.constant dense<0.000000e+00> : vector<2x8x8xf32>
    %286 = tpu.matmul %285, %268, %cst_93 {dimension_numbers = #tpu.dot_dimension_numbers<[2], [1], [1], [2], [0, 0, 0, 1, 1, 2], [0], [0]>} : vector<2x8x8xf32>, vector<2x8x8xf32>, vector<2x8x8xf32> -> vector<2x8x8xf32>
    "tpu.trace_stop"() : () -> ()
    %287 = vector.extract_strided_slice %236 {offsets = [0, 0, 16], sizes = [2, 8, 8], strides = [1, 1, 1]} : vector<2x8x32xf32> to vector<2x8x8xf32>
    %288 = vector.extract_strided_slice %240 {offsets = [0, 0, 16], sizes = [2, 8, 8], strides = [1, 1, 1]} : vector<2x8x32xf32> to vector<2x8x8xf32>
    %289 = vector.extract_strided_slice %244 {offsets = [0, 0, 16], sizes = [2, 8, 8], strides = [1, 1, 1]} : vector<2x8x32xf32> to vector<2x8x8xf32>
    "tpu.trace_start"() <{level = 10 : i32, message = "bqd,bkd->bqk"}> : () -> ()
    %cst_94 = arith.constant dense<0.000000e+00> : vector<2x8x8xf32>
    %290 = tpu.matmul %287, %288, %cst_94 {dimension_numbers = #tpu.dot_dimension_numbers<[2], [2], [1], [1], [0, 0, 0, 1, 1, 1], [0], [0]>} : vector<2x8x8xf32>, vector<2x8x8xf32>, vector<2x8x8xf32> -> vector<2x8x8xf32>
    "tpu.trace_stop"() : () -> ()
    %cst_95 = arith.constant 0.353553385 : f32
    %291 = vector.broadcast %cst_95 : f32 to vector<2x8x8xf32>
    %292 = arith.mulf %290, %291 : vector<2x8x8xf32>
    %cst_96 = arith.constant -1.000000e+30 : f32
    %293 = vector.shape_cast %5 : vector<1x8x8xi1> to vector<1x8x8xi1>
    %294 = vector.broadcast %293 : vector<1x8x8xi1> to vector<2x8x8xi1>
    %295 = vector.broadcast %cst_96 : f32 to vector<2x8x8xf32>
    %296 = arith.select %294, %292, %295 : vector<2x8x8xi1>, vector<2x8x8xf32>
    %cst_97 = arith.constant dense<0xFF800000> : vector<2x8xf32>
    %297 = vector.multi_reduction <maximumf>, %296, %cst_97 [2] : vector<2x8x8xf32> to vector<2x8xf32>
    %298 = vector.shape_cast %297 : vector<2x8xf32> to vector<2x8x1xf32>
    %299 = vector.broadcast %298 : vector<2x8x1xf32> to vector<2x8x8xf32>
    %300 = arith.subf %296, %299 : vector<2x8x8xf32>
    %301 = math.exp %300 : vector<2x8x8xf32>
    %cst_98 = arith.constant dense<0.000000e+00> : vector<2x8xf32>
    %302 = vector.multi_reduction <add>, %301, %cst_98 [2] : vector<2x8x8xf32> to vector<2x8xf32>
    %303 = vector.shape_cast %302 : vector<2x8xf32> to vector<2x8x1xf32>
    %304 = tpu.reciprocal %303 {approx = true} : vector<2x8x1xf32> -> vector<2x8x1xf32>
    %305 = vector.broadcast %304 : vector<2x8x1xf32> to vector<2x8x8xf32>
    %306 = arith.mulf %301, %305 : vector<2x8x8xf32>
    "tpu.trace_start"() <{level = 10 : i32, message = "bqk,bkd->bqd"}> : () -> ()
    %cst_99 = arith.constant dense<0.000000e+00> : vector<2x8x8xf32>
    %307 = tpu.matmul %306, %289, %cst_99 {dimension_numbers = #tpu.dot_dimension_numbers<[2], [1], [1], [2], [0, 0, 0, 1, 1, 2], [0], [0]>} : vector<2x8x8xf32>, vector<2x8x8xf32>, vector<2x8x8xf32> -> vector<2x8x8xf32>
    "tpu.trace_stop"() : () -> ()
    %308 = vector.extract_strided_slice %236 {offsets = [0, 0, 24], sizes = [2, 8, 8], strides = [1, 1, 1]} : vector<2x8x32xf32> to vector<2x8x8xf32>
    %309 = vector.extract_strided_slice %240 {offsets = [0, 0, 24], sizes = [2, 8, 8], strides = [1, 1, 1]} : vector<2x8x32xf32> to vector<2x8x8xf32>
    %310 = vector.extract_strided_slice %244 {offsets = [0, 0, 24], sizes = [2, 8, 8], strides = [1, 1, 1]} : vector<2x8x32xf32> to vector<2x8x8xf32>
    "tpu.trace_start"() <{level = 10 : i32, message = "bqd,bkd->bqk"}> : () -> ()
    %cst_100 = arith.constant dense<0.000000e+00> : vector<2x8x8xf32>
    %311 = tpu.matmul %308, %309, %cst_100 {dimension_numbers = #tpu.dot_dimension_numbers<[2], [2], [1], [1], [0, 0, 0, 1, 1, 1], [0], [0]>} : vector<2x8x8xf32>, vector<2x8x8xf32>, vector<2x8x8xf32> -> vector<2x8x8xf32>
    "tpu.trace_stop"() : () -> ()
    %cst_101 = arith.constant 0.353553385 : f32
    %312 = vector.broadcast %cst_101 : f32 to vector<2x8x8xf32>
    %313 = arith.mulf %311, %312 : vector<2x8x8xf32>
    %cst_102 = arith.constant -1.000000e+30 : f32
    %314 = vector.shape_cast %5 : vector<1x8x8xi1> to vector<1x8x8xi1>
    %315 = vector.broadcast %314 : vector<1x8x8xi1> to vector<2x8x8xi1>
    %316 = vector.broadcast %cst_102 : f32 to vector<2x8x8xf32>
    %317 = arith.select %315, %313, %316 : vector<2x8x8xi1>, vector<2x8x8xf32>
    %cst_103 = arith.constant dense<0xFF800000> : vector<2x8xf32>
    %318 = vector.multi_reduction <maximumf>, %317, %cst_103 [2] : vector<2x8x8xf32> to vector<2x8xf32>
    %319 = vector.shape_cast %318 : vector<2x8xf32> to vector<2x8x1xf32>
    %320 = vector.broadcast %319 : vector<2x8x1xf32> to vector<2x8x8xf32>
    %321 = arith.subf %317, %320 : vector<2x8x8xf32>
    %322 = math.exp %321 : vector<2x8x8xf32>
    %cst_104 = arith.constant dense<0.000000e+00> : vector<2x8xf32>
    %323 = vector.multi_reduction <add>, %322, %cst_104 [2] : vector<2x8x8xf32> to vector<2x8xf32>
    %324 = vector.shape_cast %323 : vector<2x8xf32> to vector<2x8x1xf32>
    %325 = tpu.reciprocal %324 {approx = true} : vector<2x8x1xf32> -> vector<2x8x1xf32>
    %326 = vector.broadcast %325 : vector<2x8x1xf32> to vector<2x8x8xf32>
    %327 = arith.mulf %322, %326 : vector<2x8x8xf32>
    "tpu.trace_start"() <{level = 10 : i32, message = "bqk,bkd->bqd"}> : () -> ()
    %cst_105 = arith.constant dense<0.000000e+00> : vector<2x8x8xf32>
    %328 = tpu.matmul %327, %310, %cst_105 {dimension_numbers = #tpu.dot_dimension_numbers<[2], [1], [1], [2], [0, 0, 0, 1, 1, 2], [0], [0]>} : vector<2x8x8xf32>, vector<2x8x8xf32>, vector<2x8x8xf32> -> vector<2x8x8xf32>
    "tpu.trace_stop"() : () -> ()
    %329 = tpu.concatenate %265, %286, %307, %328 in 2 : vector<2x8x8xf32>, vector<2x8x8xf32>, vector<2x8x8xf32>, vector<2x8x8xf32> -> vector<2x8x32xf32>
    %330 = vector.shape_cast %329 : vector<2x8x32xf32> to vector<16x32xf32>
    %cst_106 = arith.constant dense<0.000000e+00> : vector<16x32xf32>
    %331 = tpu.matmul %330, %192, %cst_106 {dimension_numbers = #tpu.dot_dimension_numbers<[1], [0], [0], [1], [0, 0, 1, 1], [], []>} : vector<16x32xf32>, vector<32x32xf32>, vector<16x32xf32> -> vector<16x32xf32>
    %332 = arith.addf %188, %331 : vector<16x32xf32>
    %333 = vector.broadcast %206 : vector<1x32xf32> to vector<16x32xf32>
    %334 = arith.addf %332, %333 : vector<16x32xf32>
    %cst_107 = arith.constant dense<0.000000e+00> : vector<16xf32>
    %335 = vector.multi_reduction <add>, %334, %cst_107 [1] : vector<16x32xf32> to vector<16xf32>
    %336 = vector.shape_cast %335 : vector<16xf32> to vector<16x1xf32>
    %cst_108 = arith.constant 3.200000e+01 : f32
    %337 = vector.broadcast %cst_108 : f32 to vector<16x1xf32>
    %338 = arith.divf %336, %337 : vector<16x1xf32>
    %339 = vector.broadcast %338 : vector<16x1xf32> to vector<16x32xf32>
    %340 = arith.subf %334, %339 : vector<16x32xf32>
    %341 = arith.mulf %340, %340 : vector<16x32xf32>
    %cst_109 = arith.constant dense<0.000000e+00> : vector<16xf32>
    %342 = vector.multi_reduction <add>, %341, %cst_109 [1] : vector<16x32xf32> to vector<16xf32>
    %343 = vector.shape_cast %342 : vector<16xf32> to vector<16x1xf32>
    %cst_110 = arith.constant 3.200000e+01 : f32
    %344 = vector.broadcast %cst_110 : f32 to vector<16x1xf32>
    %345 = arith.divf %343, %344 : vector<16x1xf32>
    %346 = vector.broadcast %338 : vector<16x1xf32> to vector<16x32xf32>
    %347 = arith.subf %334, %346 : vector<16x32xf32>
    %cst_111 = arith.constant 9.99999974E-6 : f32
    %348 = vector.broadcast %cst_111 : f32 to vector<16x1xf32>
    %349 = arith.addf %345, %348 : vector<16x1xf32>
    %350 = math.rsqrt %349 : vector<16x1xf32>
    %351 = vector.broadcast %350 : vector<16x1xf32> to vector<16x32xf32>
    %352 = arith.mulf %347, %351 : vector<16x32xf32>
    %353 = vector.broadcast %207 : vector<1x32xf32> to vector<16x32xf32>
    %354 = arith.mulf %352, %353 : vector<16x32xf32>
    %355 = vector.broadcast %208 : vector<1x32xf32> to vector<16x32xf32>
    %356 = arith.addf %354, %355 : vector<16x32xf32>
    %cst_112 = arith.constant dense<0.000000e+00> : vector<16x128xf32>
    %357 = tpu.matmul %356, %194, %cst_112 {dimension_numbers = #tpu.dot_dimension_numbers<[1], [0], [0], [1], [0, 0, 1, 1], [], []>} : vector<16x32xf32>, vector<32x128xf32>, vector<16x128xf32> -> vector<16x128xf32>
    %358 = vector.broadcast %200 : vector<1x128xf32> to vector<16x128xf32>
    %359 = arith.addf %357, %358 : vector<16x128xf32>
    %cst_113 = arith.constant 1.702000e+00 : f32
    %360 = vector.broadcast %cst_113 : f32 to vector<16x128xf32>
    %361 = arith.mulf %360, %359 : vector<16x128xf32>
    %362 = arith.negf %361 : vector<16x128xf32>
    %363 = math.exp %362 : vector<16x128xf32>
    %cst_114 = arith.constant 1.000000e+00 : f32
    %364 = vector.broadcast %cst_114 : f32 to vector<16x128xf32>
    %365 = arith.addf %364, %363 : vector<16x128xf32>
    %366 = arith.divf %364, %365 : vector<16x128xf32>
    %367 = arith.mulf %359, %366 : vector<16x128xf32>
    %cst_115 = arith.constant dense<0.000000e+00> : vector<16x32xf32>
    %368 = tpu.matmul %367, %196, %cst_115 {dimension_numbers = #tpu.dot_dimension_numbers<[1], [0], [0], [1], [0, 0, 1, 1], [], []>} : vector<16x128xf32>, vector<128x32xf32>, vector<16x32xf32> -> vector<16x32xf32>
    %369 = arith.addf %334, %368 : vector<16x32xf32>
    %370 = vector.broadcast %209 : vector<1x32xf32> to vector<16x32xf32>
    %371 = arith.addf %369, %370 : vector<16x32xf32>
    %c0_116 = arith.constant 0 : index
    %c0_117 = arith.constant 0 : index
    %372 = vector.load %arg9[%c0_116, %c0_117] : memref<2x32xf32, #tpu.memory_space<vmem>>, vector<1x32xf32>
    %c1_118 = arith.constant 1 : index
    %c0_119 = arith.constant 0 : index
    %373 = vector.load %arg9[%c1_118, %c0_119] : memref<2x32xf32, #tpu.memory_space<vmem>>, vector<1x32xf32>
    %cst_120 = arith.constant dense<0.000000e+00> : vector<16xf32>
    %374 = vector.multi_reduction <add>, %371, %cst_120 [1] : vector<16x32xf32> to vector<16xf32>
    %375 = vector.shape_cast %374 : vector<16xf32> to vector<16x1xf32>
    %cst_121 = arith.constant 3.200000e+01 : f32
    %376 = vector.broadcast %cst_121 : f32 to vector<16x1xf32>
    %377 = arith.divf %375, %376 : vector<16x1xf32>
    %378 = vector.broadcast %377 : vector<16x1xf32> to vector<16x32xf32>
    %379 = arith.subf %371, %378 : vector<16x32xf32>
    %380 = arith.mulf %379, %379 : vector<16x32xf32>
    %cst_122 = arith.constant dense<0.000000e+00> : vector<16xf32>
    %381 = vector.multi_reduction <add>, %380, %cst_122 [1] : vector<16x32xf32> to vector<16xf32>
    %382 = vector.shape_cast %381 : vector<16xf32> to vector<16x1xf32>
    %cst_123 = arith.constant 3.200000e+01 : f32
    %383 = vector.broadcast %cst_123 : f32 to vector<16x1xf32>
    %384 = arith.divf %382, %383 : vector<16x1xf32>
    %385 = vector.broadcast %377 : vector<16x1xf32> to vector<16x32xf32>
    %386 = arith.subf %371, %385 : vector<16x32xf32>
    %cst_124 = arith.constant 9.99999974E-6 : f32
    %387 = vector.broadcast %cst_124 : f32 to vector<16x1xf32>
    %388 = arith.addf %384, %387 : vector<16x1xf32>
    %389 = math.rsqrt %388 : vector<16x1xf32>
    %390 = vector.broadcast %389 : vector<16x1xf32> to vector<16x32xf32>
    %391 = arith.mulf %386, %390 : vector<16x32xf32>
    %392 = vector.broadcast %372 : vector<1x32xf32> to vector<16x32xf32>
    %393 = arith.mulf %391, %392 : vector<16x32xf32>
    %394 = vector.broadcast %373 : vector<1x32xf32> to vector<16x32xf32>
    %395 = arith.addf %393, %394 : vector<16x32xf32>
    %396 = vector.shape_cast %395 : vector<16x32xf32> to vector<2x8x32xf32>
    %c0_125 = arith.constant 0 : index
    %c0_126 = arith.constant 0 : index
    %c0_127 = arith.constant 0 : index
    %397 = vector.load %arg11[%c0_125, %c0_126, %c0_127] : memref<2x8x32xf32, #tpu.memory_space<vmem>>, vector<2x8x32xf32>
    tpu.vector_store %arg11[%c0_125, %c0_126, %c0_127], %396 {strides = array<i32>} : memref<2x8x32xf32, #tpu.memory_space<vmem>>, vector<2x8x32xf32>,
    %c0_128 = arith.constant 0 : index
    %398 = memref.load %arg1[%c0_128] : memref<2xi32, #tpu.memory_space<smem>>
    %c0_129 = arith.constant 0 : index
    %399 = arith.index_cast %398 : i32 to index
    %c0_130 = arith.constant 0 : index
    %400 = vector.load %arg11[%c0_129, %399, %c0_130] : memref<2x8x32xf32, #tpu.memory_space<vmem>>, vector<1x1x32xf32>
    %401 = vector.shape_cast %400 : vector<1x1x32xf32> to vector<1x32xf32>
    %c1_131 = arith.constant 1 : index
    %402 = memref.load %arg1[%c1_131] : memref<2xi32, #tpu.memory_space<smem>>
    %c1_132 = arith.constant 1 : index
    %403 = arith.index_cast %402 : i32 to index
    %c0_133 = arith.constant 0 : index
    %404 = vector.load %arg11[%c1_132, %403, %c0_133] : memref<2x8x32xf32, #tpu.memory_space<vmem>>, vector<1x1x32xf32>
    %405 = vector.shape_cast %404 : vector<1x1x32xf32> to vector<1x32xf32>
    %406 = tpu.concatenate %401, %405 in 0 : vector<1x32xf32>, vector<1x32xf32> -> vector<2x32xf32>
    %c0_134 = arith.constant 0 : index
    %c0_135 = arith.constant 0 : index
    %407 = vector.load %arg10[%c0_134, %c0_135] : memref<32x16xf32, #tpu.memory_space<vmem>>, vector<32x16xf32>
    %cst_136 = arith.constant dense<0.000000e+00> : vector<2x16xf32>
    %408 = tpu.matmul %406, %407, %cst_136 {dimension_numbers = #tpu.dot_dimension_numbers<[1], [0], [0], [1], [0, 0, 1, 1], [], []>} : vector<2x32xf32>, vector<32x16xf32>, vector<2x16xf32> -> vector<2x16xf32>
    %c0_137 = arith.constant 0 : index
    %c0_138 = arith.constant 0 : index
    %409 = vector.load %arg12[%c0_137, %c0_138] : memref<2x16xf32, #tpu.memory_space<vmem>>, vector<2x16xf32>
    tpu.vector_store %arg12[%c0_137, %c0_138], %408 {strides = array<i32>} : memref<2x16xf32, #tpu.memory_space<vmem>>, vector<2x16xf32>,
    return
  }
  func.func @transform_0(%arg0: i32, %arg1: memref<2xi32, #tpu.memory_space<smem>>) -> (i32, i32, i32) {
    %c0_i32 = arith.constant 0 : i32
    %c0_i32_0 = arith.constant 0 : i32
    %c0_i32_1 = arith.constant 0 : i32
    %c0_i32_2 = arith.constant 0 : i32
    return %c0_i32, %c0_i32_0, %c0_i32_1 : i32, i32, i32
  }
  func.func @transform_1(%arg0: i32, %arg1: memref<2xi32, #tpu.memory_space<smem>>) -> (i32, i32, i32) {
    %c0_i32 = arith.constant 0 : i32
    %c0_i32_0 = arith.constant 0 : i32
    %c0_i32_1 = arith.constant 0 : i32
    %c0_i32_2 = arith.constant 0 : i32
    return %c0_i32, %c0_i32_0, %c0_i32_1 : i32, i32, i32
  }
  func.func @transform_2(%arg0: i32, %arg1: memref<2xi32, #tpu.memory_space<smem>>) -> (i32, i32, i32) {
    %c0_i32 = arith.constant 0 : i32
    %c0_i32_0 = arith.constant 0 : i32
    %c0_i32_1 = arith.constant 0 : i32
    %c0_i32_2 = arith.constant 0 : i32
    return %c0_i32, %c0_i32_0, %c0_i32_1 : i32, i32, i32
  }
  func.func @transform_3(%arg0: i32, %arg1: memref<2xi32, #tpu.memory_space<smem>>) -> (i32, i32, i32) {
    %c0_i32 = arith.constant 0 : i32
    %c0_i32_0 = arith.constant 0 : i32
    %c0_i32_1 = arith.constant 0 : i32
    %c0_i32_2 = arith.constant 0 : i32
    return %c0_i32, %c0_i32_0, %c0_i32_1 : i32, i32, i32
  }
  func.func @transform_4(%arg0: i32, %arg1: memref<2xi32, #tpu.memory_space<smem>>) -> (i32, i32, i32) {
    %c0_i32 = arith.constant 0 : i32
    %c0_i32_0 = arith.constant 0 : i32
    %c0_i32_1 = arith.constant 0 : i32
    %c0_i32_2 = arith.constant 0 : i32
    return %c0_i32, %c0_i32_0, %c0_i32_1 : i32, i32, i32
  }
  func.func @transform_5(%arg0: i32, %arg1: memref<2xi32, #tpu.memory_space<smem>>) -> (i32, i32, i32) {
    %c0_i32 = arith.constant 0 : i32
    %c0_i32_0 = arith.constant 0 : i32
    %c0_i32_1 = arith.constant 0 : i32
    %c0_i32_2 = arith.constant 0 : i32
    return %c0_i32, %c0_i32_0, %c0_i32_1 : i32, i32, i32
  }
  func.func @transform_6(%arg0: i32, %arg1: memref<2xi32, #tpu.memory_space<smem>>) -> (i32, i32, i32) {
    %c0_i32 = arith.constant 0 : i32
    %c0_i32_0 = arith.constant 0 : i32
    %c0_i32_1 = arith.constant 0 : i32
    %c0_i32_2 = arith.constant 0 : i32
    return %c0_i32, %c0_i32_0, %c0_i32_1 : i32, i32, i32
  }
  func.func @transform_7(%arg0: i32, %arg1: memref<2xi32, #tpu.memory_space<smem>>) -> (i32, i32) {
    %c0_i32 = arith.constant 0 : i32
    %c0_i32_0 = arith.constant 0 : i32
    %c0_i32_1 = arith.constant 0 : i32
    return %c0_i32, %c0_i32_0 : i32, i32
  }
  func.func @transform_8(%arg0: i32, %arg1: memref<2xi32, #tpu.memory_space<smem>>) -> (i32, i32) {
    %c0_i32 = arith.constant 0 : i32
    %c0_i32_0 = arith.constant 0 : i32
    %c0_i32_1 = arith.constant 0 : i32
    return %c0_i32, %c0_i32_0 : i32, i32
  }
  func.func @transform_9(%arg0: i32, %arg1: memref<2xi32, #tpu.memory_space<smem>>) -> (i32, i32, i32) {
    %c0_i32 = arith.constant 0 : i32
    %c0_i32_0 = arith.constant 0 : i32
    %c0_i32_1 = arith.constant 0 : i32
    %c0_i32_2 = arith.constant 0 : i32
    return %c0_i32, %c0_i32_0, %c0_i32_1 : i32, i32, i32
  }
  func.func @transform_10(%arg0: i32, %arg1: memref<2xi32, #tpu.memory_space<smem>>) -> (i32, i32) {
    %c0_i32 = arith.constant 0 : i32
    %c0_i32_0 = arith.constant 0 : i32
    %c0_i32_1 = arith.constant 0 : i32
    return %c0_i32, %c0_i32_0 : i32, i32
  }
}

</mosaic_0001>

<bundles_post_ra>
// kernel: text_encoder_forward.1
= control target key start
LH: loop header
LB: loop body
LE: loop exit
PB: predicated region body
PF: predicated region fallthrough
CT: control target
= control target key end

     0   :  { %s5637_s0 = inlined_call_operand.vmem [shape: s32[2], index: 0, kind: input, shape index: {}]   ;;  %s5638_s1 = inlined_call_operand.vmem [shape: f32[2,8,32], index: 1, kind: input, shape index: {}]   ;;  %s5639_s2 = inlined_call_operand.vmem [shape: f32[2,32,96], index: 2, kind: input, shape index: {}]   ;;  %s5640_s3 = inlined_call_operand.vmem [shape: f32[2,32,32], index: 3, kind: input, shape index: {}]   ;;  %s5641_s4 = inlined_call_operand.vmem [shape: f32[2,32,128], index: 4, kind: input, shape index: {}]   ;;  %s5642_s5 = inlined_call_operand.vmem [shape: f32[2,128,32], index: 5, kind: input, shape index: {}]   ;;  %s5643_s6 = inlined_call_operand.vmem [shape: f32[2,9,32], index: 6, kind: input, shape index: {}]   ;;  %s5644_s7 = inlined_call_operand.vmem [shape: f32[2,1,128], index: 7, kind: input, shape index: {}]   ;;  %s5645_s8 = inlined_call_operand.vmem [shape: f32[2,32], index: 8, kind: input, shape index: {}]   ;;  %s5646_s9 = inlined_call_operand.vmem [shape: f32[32,16], index: 9, kind: input, shape index: {}]   ;;  %s5647_s10 = inlined_call_operand.hbm [shape: f32[2,8,32], index: 10, kind: output, shape index: {0}]   ;;  %s5648_s11 = inlined_call_operand.hbm [shape: f32[2,16], index: 11, kind: output, shape index: {1}]  }
   0x1   :  { %s17_s19 = sshll.u32 %s5637_s0, 4  ;;  %s18_s19 = int_to_ptr.vmem [resolvable:$true] %s17_s19 }
   0x2   :  { %s4735_s20 = scalar_lea.vmem %s18_s19, 16  ;;  %p4740_p1 = scmp.lt.s32.totalorder %s18_s19, %s18_s19 }
   0x3   :  { %p4736_p0 = scmp.ne.s32.totalorder %s18_s19, %s4735_s20  ;;  %p4741_p2 = scmp.lt.s32.totalorder %s4735_s20, %s4735_s20 }
   0x5   :  { %p4742_p3 = por %p4741_p2, %p4740_p1 }
   0x7   :  { %p4743_p4 = pnand %p4742_p3, %p4736_p0 }
   0x9   :  { %4746 = shalt.err (!%p4743_p4)  }
   0xa   :  { %s4797_s21 = smov [#allocation3]  }
   0xb   :  { %20 = dma.vmem_to_smem %s18_s19, 16, %s4797_s21, [#allocation2] }
   0xc   :  { %4791 = dma.done.wait [#allocation2], 16 }
   0xd   :  { %4792 = vsyncadd [#allocation2], 4294967280 }
   0xe   :  { %22 = sfence }
   0xf   :  { %23 = vsyncpa [#allocation5], 0  ;;  %v4885_v0 = vld [vmem:[%s5638_s1] sm:$0xff]  ;;  %vm81_vm0 = vcmask 261120   ;;  %v4890_v1 = vld [vmem:[%s5638_s1 + $0x8] sm:$0xff] }
  0x10   :  { %24 = vsyncpa [#allocation7], 0  ;;  %v82_v2 = vsel %vm81_vm0, %v4885_v0, 0.0  ;;  %v85_v3 = vsel %vm81_vm0, %v4890_v1, 0.0  ;;  %v50_v14 = vld [vmem:[%s5639_s2] sm:$0xff]  ;;  %v51_v15 = vld [vmem:[%s5639_s2 + $0x8] sm:$0xff]  ;;  %v45_v20 = vlaneseq }
  0x11   :  { %83 = vadd.xlane.f32.xlu0 %v82_v2  ;;  %v52_v16 = vld [vmem:[%s5639_s2 + $0x10] sm:$0xff]  ;;  %v4495_v17 = vpack.c.bf16 %v51_v15, %v50_v14  ;;  %v53_v18 = vld [vmem:[%s5639_s2 + $0x18] sm:$0xff]  ;;  %v4918_v23 = vld [vmem:[%s5643_s6] sm:$0xff]  ;;  %s4798_s15 = smov 32   ;;  %v4799_v43 = vmov 0.0   ;;  %vm4800_vm1 = vmmov 0  }
  0x12   :  { %v4499_v19 = vpack.c.bf16 %v53_v18, %v52_v16  ;;  %v4912_v21 = vshrl.u32 %v45_v20, 7  ;;  %4219 = vmatprep.subr.mxu0 %v4799_v43  ;;  %4221 = vmatprep.mubr.msk.f32.mxu0 %vm4800_vm1, %v4799_v43  ;;  %s4801_s16 = smov 96   ;;  %vm231_vm2 = vcmask 64512   ;;  %v48_v55 = vand.u32 127, %v45_v20  ;;  %s4802_s17 = smov 64  }
  0x13   :  { %4496 = vmatprep.subr.bf16.mxu1 %v4495_v17  ;;  %s4803_s18 = smov 88   ;;  %s4804_s19 = smov 120   ;;  %vm1598_vm4 = vcmask 195584   ;;  %vm1595_vm5 = vcmask 130048   ;;  %vm3829_vm6 = vcmask 1040384  }
  0x14   :  { %4498 = vmatpush3.bf16.msra.mxu1 %v4495_v17  ;;  %v210_v22 = vsub.s32 3, %v4912_v21  ;;  %v111_v31 = vsub.s32 0, %v4912_v21  ;;  %v117_v32 = vsub.s32 1, %v4912_v21  ;;  %v204_v49 = vsub.s32 2, %v4912_v21  ;;  %s4805_s20 = smov 56   ;;  %s4806_s21 = smov 80  }
  0x15   :  { %86 = vadd.xlane.f32.xlu0 %v85_v3  ;;  %4500 = vmatprep.subr.bf16.mxu1 %v4499_v19  ;;  %vm4969_vm3 = vcmp.le.s32.totalorder %v48_v55, %v4912_v21  ;;  %s4807_s22 = smov 112   ;;  %s4808_s23 = smov 48  }
  0x16   :  { %v211_v24 = vrot.slane %v4918_v23, %v210_v22  ;;  %v112_v33 = vrot.slane %v4918_v23, %v111_v31  ;;  %v118_v36 = vrot.slane %v4918_v23, %v117_v32  ;;  %v205_v50 = vrot.slane %v4918_v23, %v204_v49  ;;  %s4809_s0 = smov 72   ;;  %s4810_s24 = smov 104  }
  0x17   :  { %s4811_s1 = smov 40   ;;  %s4812_s25 = smov 8  }
  0x18   :  { %4502 = vmatpush3.bf16.msra.mxu1 %v4499_v19  ;;  %s5649_s26 = smov 16   ;;  %s5651_s27 = smov 24  }
  0x19   :  { %4199 = vmatprep.subr.mxu1 %v4799_v43 }
  0x2b   :  { %213 = vrot.lane.b32.xlu0 %v211_v24, %s4798_s15 }
  0x9e   :  { %v84_v4 = vpop.xlane.xlu0 %83 }
  0x9f   :  { %v89_v5 = vmul.f32 0.03125, %v84_v4 }
  0xa1   :  { %v91_v6 = vsub.f32 %v4885_v0, %v89_v5  ;;  %v220_v5 = vsub.s32 4, %v4912_v21 }
  0xa2   :  { %v87_v7 = vpop.xlane.xlu0 %86 }
  0xa3   :  { %v90_v8 = vmul.f32 0.03125, %v87_v7  ;;  %v93_v9 = vmul.f32 %v91_v6, %v91_v6 }
  0xa5   :  { %v92_v10 = vsub.f32 %v4890_v1, %v90_v8  ;;  %v95_v11 = vsel %vm81_vm0, %v93_v9, 0.0 }
  0xa6   :  { %96 = vadd.xlane.f32.xlu1 %v95_v11  ;;  %v214_v44 = vpop.permute.xlu0 %213 }
  0xa7   :  { %v94_v12 = vmul.f32 %v92_v10, %v92_v10 }
  0xa9   :  { %v98_v13 = vsel %vm81_vm0, %v94_v12, 0.0 }
  0xaa   :  { %99 = vadd.xlane.f32.xlu1 %v98_v13 }
 0x133   :  { %v97_v25 = vpop.xlane.xlu1 %96 }
 0x134   :  { %v101_v26 = vmul.f32 0.03125, %v97_v25 }
 0x136   :  { %v103_v27 = vadd.f32 1e-05, %v101_v26 }
 0x137   :  { %v100_v28 = vpop.xlane.xlu1 %99 }
 0x138   :  { %4635 = vrsqrt.f32 %v103_v27  ;;  %v102_v29 = vmul.f32 0.03125, %v100_v28 }
 0x13a   :  { %v104_v30 = vadd.f32 1e-05, %v102_v29 }
 0x13c   :  { %4637 = vrsqrt.f32 %v104_v30 }
 0x142   :  { %v4636_v34 = vpop.eup %4635 }
 0x143   :  { %v107_v35 = vmul.f32 %v4636_v34, %v91_v6  ;;  %v221_v6 = vrot.slane %v4918_v23, %v220_v5 }
 0x145   :  { %v113_v37 = vmul.f32 %v112_v33, %v107_v35 }
 0x146   :  { %v4638_v38 = vpop.eup %4637 }
 0x147   :  { %v108_v39 = vmul.f32 %v4638_v38, %v92_v10  ;;  %v119_v40 = vadd.f32 %v118_v36, %v113_v37 }
 0x149   :  { %v114_v41 = vmul.f32 %v112_v33, %v108_v39  ;;  %4196 = vmatprep.mubr.msk.f32.mxu1 %vm81_vm0, %v119_v40 }
 0x14b   :  { %v120_v42 = vadd.f32 %v118_v36, %v114_v41 }
 0x14d   :  { %4197 = vmatmul.mubr.msk.f32.vlgmr.msra.gmra.mrb[0].mxu1 %vm81_vm0, %v120_v42 }
 0x14e   :  { %4201 = vmatprep.mubr.msk.f32.mxu1 %vm4800_vm1, %v4799_v43 }
 0x220   :  { %v4198_v45 = vpop.f32.mrb[0].mxu1 }
 0x221   :  { %v193_v46 = vpop.f32.mrb[1].mxu1  ;;  %v4944_v48 = vadd.f32 %v4198_v45, %v214_v44  ;;  %v4961_v54 = vadd.f32 %v4198_v45, %v205_v50 }
 0x222   :  { %v4940_v47 = vadd.f32 %v214_v44, %v193_v46  ;;  %v4953_v52 = vadd.f32 %v205_v50, %v193_v46 }
 0x224   :  { %229 = vrot.lane.b32.xlu1 %v4940_v47, %s4801_s16 }
 0x228   :  { %308 = vrot.lane.b32.xlu1 %v4944_v48, %s4801_s16 }
 0x296   :  { %v230_v51 = vpop.permute.xlu1 %229 }
 0x297   :  { %4200 = vmatpush3.xpose.msk.msra.mxu1 %vm231_vm2, %v230_v51 }
 0x298   :  { %4204 = vmatprep.subr.mxu1 %v4799_v43 }
 0x29a   :  { %4202 = vmatmul.mubr.msk.f32.vlgmr.msra.gmra.mrb[2].mxu1 %vm231_vm2, %v4953_v52  ;;  %v309_v53 = vpop.permute.xlu1 %308 }
 0x29b   :  { %4205 = vmatpush3.xpose.msk.msra.mxu1 %vm231_vm2, %v309_v53  ;;  %4206 = vmatprep.mubr.msk.f32.mxu1 %vm4800_vm1, %v4799_v43 }
 0x29c   :  { %4209 = vmatprep.subr.mxu1 %v4799_v43 }
 0x29e   :  { %4207 = vmatmul.mubr.msk.f32.vlgmr.msra.gmra.mrb[4].mxu1 %vm231_vm2, %v4961_v54 }
 0x29f   :  { %4211 = vmatprep.mubr.msk.f32.mxu1 %vm4800_vm1, %v4799_v43 }
 0x36d   :  { %v303_v57 = vpop.f32.mrb[2].mxu1 }
 0x36e   :  { %v385_v58 = vmul.f32 0.35355338, %v303_v57  ;;  %v4203_v59 = vpop.f32.mrb[3].mxu1 }
 0x370   :  { %v389_v60 = vsel %vm4969_vm3, %v385_v58, -1e+30 }
 0x371   :  { %v381_v61 = vpop.f32.mrb[4].mxu1  ;;  %v391_v62 = vsel %vm231_vm2, %v389_v60, -inf }
 0x372   :  { %v386_v63 = vmul.f32 0.35355338, %v381_v61  ;;  %392 = vmax.xlane.f32.xlu1 %v391_v62  ;;  %v4208_v2 = vpop.f32.mrb[5].mxu1 }
 0x374   :  { %v390_v3 = vsel %vm4969_vm3, %v386_v63, -1e+30 }
 0x375   :  { %v394_v4 = vsel %vm231_vm2, %v390_v3, -inf }
 0x376   :  { %395 = vmax.xlane.f32.xlu0 %v394_v4 }
 0x38c   :  { %223 = vrot.lane.b32.xlu0 %v221_v6, %s4802_s17 }
 0x3ff   :  { %v393_v11 = vpop.xlane.xlu1 %392 }
 0x400   :  { %v397_v12 = vsub.f32 %v389_v60, %v393_v11 }
 0x402   :  { %v399_v13 = vmul.f32 1.442695, %v397_v12 }
 0x403   :  { %v396_v7 = vpop.xlane.xlu0 %395 }
 0x404   :  { %v398_v14 = vsub.f32 %v390_v3, %v396_v7  ;;  %4639 = vpow2.f32 %v399_v13 }
 0x406   :  { %v401_v15 = vmul.f32 1.442695, %v398_v14 }
 0x407   :  { %v224_v8 = vpop.permute.xlu0 %223 }
 0x408   :  { %v4984_v9 = vadd.f32 %v224_v8, %v193_v46  ;;  %v4986_v10 = vadd.f32 %v4198_v45, %v224_v8  ;;  %4641 = vpow2.f32 %v401_v15 }
 0x40a   :  { %491 = vrot.lane.b32.xlu0 %v4986_v10, %s4802_s17  ;;  %414 = vrot.lane.b32.xlu1 %v4984_v9, %s4802_s17 }
 0x40e   :  { %569 = vrot.lane.b32.xlu0 %v4940_v47, %s4803_s18  ;;  %647 = vrot.lane.b32.xlu1 %v4944_v48, %s4803_s18  ;;  %v4640_v16 = vpop.eup %4639 }
 0x40f   :  { %v403_v17 = vsel %vm231_vm2, %v4640_v16, 0.0 }
 0x412   :  { %567 = vrot.lane.b32.xlu0 %v4953_v52, %s4804_s19  ;;  %v4642_v18 = vpop.eup %4641 }
 0x413   :  { %v406_v19 = vsel %vm231_vm2, %v4642_v18, 0.0 }
 0x432   :  { %404 = vadd.xlane.f32.xlu1 %v403_v17 }
 0x436   :  { %407 = vadd.xlane.f32.xlu1 %v406_v19 }
 0x447   :  { %645 = vrot.lane.b32.xlu1 %v4961_v54, %s4804_s19 }
 0x47c   :  { %v492_v20 = vpop.permute.xlu0 %491  ;;  %v415_v24 = vpop.permute.xlu1 %414 }
 0x47d   :  { %4210 = vmatpush3.msra.mxu1 %v415_v24 }
 0x47e   :  { %4214 = vmatprep.subr.mxu1 %v4799_v43 }
 0x480   :  { %v570_v25 = vpop.permute.xlu0 %569  ;;  %v648_v27 = vpop.permute.xlu1 %647 }
 0x481   :  { %4220 = vmatpush3.xpose.msk.msra.mxu0 %vm231_vm2, %v570_v25 }
 0x482   :  { %4229 = vmatprep.subr.mxu0 %v4799_v43 }
 0x484   :  { %v568_v26 = vpop.permute.xlu0 %567 }
 0x485   :  { %4222 = vmatmul.mubr.msk.f32.vlgmr.msra.gmra.mrb[0].mxu0 %vm231_vm2, %v568_v26 }
 0x486   :  { %4231 = vmatprep.mubr.msk.f32.mxu0 %vm4800_vm1, %v4799_v43 }
 0x4bf   :  { %v405_v28 = vpop.xlane.xlu1 %404 }
 0x4c0   :  { %4643 = vrcp.f32 %v405_v28 }
 0x4c3   :  { %v408_v29 = vpop.xlane.xlu1 %407 }
 0x4c4   :  { %4645 = vrcp.f32 %v408_v29 }
 0x4c7   :  { %v646_v36 = vpop.permute.xlu1 %645 }
 0x4ca   :  { %v4644_v30 = vpop.eup %4643 }
 0x4cb   :  { %v411_v33 = vmul.f32 %v4644_v30, %v4640_v16 }
 0x4cd   :  { %4212 = vmatmul.mubr.msk.f32.vlgmr.msra.gmra.mrb[6].mxu1 %vm231_vm2, %v411_v33 }
 0x4ce   :  { %v4646_v34 = vpop.eup %4645  ;;  %4215 = vmatpush3.msra.mxu1 %v492_v20  ;;  %4216 = vmatprep.mubr.msk.f32.mxu1 %vm4800_vm1, %v4799_v43 }
 0x4cf   :  { %v412_v35 = vmul.f32 %v4646_v34, %v4642_v18  ;;  %4224 = vmatprep.subr.mxu1 %v4799_v43 }
 0x4d1   :  { %4217 = vmatmul.mubr.msk.f32.vlgmr.msra.gmra.mrb[8].mxu1 %vm231_vm2, %v412_v35 }
 0x4d2   :  { %4226 = vmatprep.mubr.msk.f32.mxu1 %vm4800_vm1, %v4799_v43 }
 0x4d5   :  { %4225 = vmatpush3.xpose.msk.msra.mxu1 %vm231_vm2, %v648_v27 }
 0x4d6   :  { %4234 = vmatprep.subr.mxu1 %v4799_v43 }
 0x4d8   :  { %4227 = vmatmul.mubr.msk.f32.vlgmr.msra.gmra.mrb[10].mxu1 %vm231_vm2, %v646_v36 }
 0x4d9   :  { %4236 = vmatprep.mubr.msk.f32.mxu1 %vm4800_vm1, %v4799_v43 }
 0x558   :  { %v641_v37 = vpop.f32.mrb[0].mxu0 }
 0x559   :  { %v723_v38 = vmul.f32 0.35355338, %v641_v37  ;;  %v4223_v39 = vpop.f32.mrb[1].mxu0 }
 0x55b   :  { %v725_v40 = vsel %vm4969_vm3, %v723_v38, -1e+30 }
 0x55c   :  { %v727_v41 = vsel %vm231_vm2, %v725_v40, -inf }
 0x55d   :  { %728 = vmax.xlane.f32.xlu0 %v727_v41 }
 0x5a0   :  { %v5023_v42 = vpop.f32.mrb[6].mxu1 }
 0x5a1   :  { %v4213_v44 = vpop.f32.mrb[7].mxu1 }
 0x5a4   :  { %v5025_v45 = vpop.f32.mrb[8].mxu1 }
 0x5a5   :  { %v4218_v46 = vpop.f32.mrb[9].mxu1 }
 0x5ab   :  { %v719_v50 = vpop.f32.mrb[10].mxu1 }
 0x5ac   :  { %v724_v51 = vmul.f32 0.35355338, %v719_v50  ;;  %v4228_v53 = vpop.f32.mrb[11].mxu1 }
 0x5ae   :  { %v726_v55 = vsel %vm4969_vm3, %v724_v51, -1e+30 }
 0x5af   :  { %v730_v57 = vsel %vm231_vm2, %v726_v55, -inf }
 0x5b0   :  { %731 = vmax.xlane.f32.xlu1 %v730_v57 }
 0x5c1   :  { %825 = vrot.lane.b32.xlu1 %v4986_v10, %s4805_s20 }
 0x5c5   :  { %903 = vrot.lane.b32.xlu1 %v4940_v47, %s4806_s21 }
 0x5c9   :  { %981 = vrot.lane.b32.xlu1 %v4944_v48, %s4806_s21 }
 0x5cd   :  { %979 = vrot.lane.b32.xlu1 %v4961_v54, %s4807_s22 }
 0x5ea   :  { %v729_v58 = vpop.xlane.xlu0 %728 }
 0x5eb   :  { %v733_v59 = vsub.f32 %v725_v40, %v729_v58 }
 0x5ed   :  { %v735_v60 = vmul.f32 1.442695, %v733_v59 }
 0x5ef   :  { %4647 = vpow2.f32 %v735_v60 }
 0x5f9   :  { %v4648_v61 = vpop.eup %4647 }
 0x5fa   :  { %v739_v62 = vsel %vm231_vm2, %v4648_v61, 0.0 }
 0x5fb   :  { %740 = vadd.xlane.f32.xlu0 %v739_v62 }
 0x611   :  { %749 = vrot.lane.b32.xlu0 %v4984_v9, %s4805_s20 }
 0x63d   :  { %v732_v63 = vpop.xlane.xlu1 %731 }
 0x63e   :  { %v734_v2 = vsub.f32 %v726_v55, %v732_v63 }
 0x640   :  { %v737_v3 = vmul.f32 1.442695, %v734_v2 }
 0x641   :  { %v826_v4 = vpop.permute.xlu1 %825 }
 0x642   :  { %4649 = vpow2.f32 %v737_v3  ;;  %4235 = vmatpush3.msra.mxu1 %v826_v4 }
 0x643   :  { %4244 = vmatprep.subr.mxu1 %v4799_v43 }
 0x645   :  { %v904_v14 = vpop.permute.xlu1 %903 }
 0x649   :  { %v982_v18 = vpop.permute.xlu1 %981 }
 0x64c   :  { %v4650_v6 = vpop.eup %4649 }
 0x64d   :  { %v742_v7 = vsel %vm231_vm2, %v4650_v6, 0.0  ;;  %v980_v20 = vpop.permute.xlu1 %979 }
 0x64e   :  { %743 = vadd.xlane.f32.xlu0 %v742_v7 }
 0x664   :  { %901 = vrot.lane.b32.xlu0 %v4953_v52, %s4807_s22 }
 0x688   :  { %v741_v8 = vpop.xlane.xlu0 %740 }
 0x689   :  { %4651 = vrcp.f32 %v741_v8 }
 0x68c   :  { %v750_v11 = vpop.permute.xlu0 %749 }
 0x68d   :  { %4230 = vmatpush3.msra.mxu0 %v750_v11 }
 0x68e   :  { %4239 = vmatprep.subr.mxu0 %v4799_v43 }
 0x693   :  { %v4652_v12 = vpop.eup %4651 }
 0x694   :  { %v747_v13 = vmul.f32 %v4652_v12, %v4648_v61 }
 0x696   :  { %4232 = vmatmul.mubr.msk.f32.vlgmr.msra.gmra.mrb[2].mxu0 %vm231_vm2, %v747_v13 }
 0x697   :  { %4240 = vmatpush3.xpose.msk.msra.mxu0 %vm231_vm2, %v904_v14  ;;  %4241 = vmatprep.mubr.msk.f32.mxu0 %vm4800_vm1, %v4799_v43 }
 0x698   :  { %4249 = vmatprep.subr.mxu0 %v4799_v43 }
 0x6db   :  { %v744_v15 = vpop.xlane.xlu0 %743 }
 0x6dc   :  { %4653 = vrcp.f32 %v744_v15 }
 0x6df   :  { %v902_v16 = vpop.permute.xlu0 %901 }
 0x6e0   :  { %4242 = vmatmul.mubr.msk.f32.vlgmr.msra.gmra.mrb[4].mxu0 %vm231_vm2, %v902_v16 }
 0x6e1   :  { %4251 = vmatprep.mubr.msk.f32.mxu0 %vm4800_vm1, %v4799_v43 }
 0x6e6   :  { %v4654_v17 = vpop.eup %4653 }
 0x6e7   :  { %v748_v19 = vmul.f32 %v4654_v17, %v4650_v6 }
 0x6e9   :  { %4237 = vmatmul.mubr.msk.f32.vlgmr.msra.gmra.mrb[12].mxu1 %vm231_vm2, %v748_v19 }
 0x6ea   :  { %4245 = vmatpush3.xpose.msk.msra.mxu1 %vm231_vm2, %v982_v18  ;;  %4246 = vmatprep.mubr.msk.f32.mxu1 %vm4800_vm1, %v4799_v43 }
 0x6eb   :  { %4254 = vmatprep.subr.mxu1 %v4799_v43 }
 0x6ed   :  { %4247 = vmatmul.mubr.msk.f32.vlgmr.msra.gmra.mrb[14].mxu1 %vm231_vm2, %v980_v20 }
 0x6ee   :  { %4256 = vmatprep.mubr.msk.f32.mxu1 %vm4800_vm1, %v4799_v43 }
 0x769   :  { %v5062_v24 = vpop.f32.mrb[2].mxu0 }
 0x76a   :  { %v4233_v25 = vpop.f32.mrb[3].mxu0 }
 0x7b3   :  { %v975_v26 = vpop.f32.mrb[4].mxu0 }
 0x7b4   :  { %v1057_v27 = vmul.f32 0.35355338, %v975_v26  ;;  %v4243_v28 = vpop.f32.mrb[5].mxu0 }
 0x7b6   :  { %v1059_v29 = vsel %vm4969_vm3, %v1057_v27, -1e+30 }
 0x7b7   :  { %v1061_v30 = vsel %vm231_vm2, %v1059_v29, -inf }
 0x7b8   :  { %1062 = vmax.xlane.f32.xlu0 %v1061_v30 }
 0x7bc   :  { %v5067_v33 = vpop.f32.mrb[12].mxu1 }
 0x7bd   :  { %v4238_v34 = vpop.f32.mrb[13].mxu1 }
 0x7c0   :  { %v1053_v35 = vpop.f32.mrb[14].mxu1 }
 0x7c1   :  { %v1058_v36 = vmul.f32 0.35355338, %v1053_v35  ;;  %v4248_v37 = vpop.f32.mrb[15].mxu1 }
 0x7c3   :  { %v1060_v38 = vsel %vm4969_vm3, %v1058_v36, -1e+30 }
 0x7c4   :  { %v1064_v39 = vsel %vm231_vm2, %v1060_v38, -inf }
 0x7c5   :  { %1065 = vmax.xlane.f32.xlu1 %v1064_v39 }
 0x7d6   :  { %1159 = vrot.lane.b32.xlu1 %v4986_v10, %s4808_s23 }
 0x7da   :  { %1237 = vrot.lane.b32.xlu1 %v4940_v47, %s4809_s0 }
 0x7de   :  { %1315 = vrot.lane.b32.xlu1 %v4944_v48, %s4809_s0 }
 0x7e2   :  { %1313 = vrot.lane.b32.xlu1 %v4961_v54, %s4810_s24 }
 0x845   :  { %v1063_v40 = vpop.xlane.xlu0 %1062 }
 0x846   :  { %v1067_v41 = vsub.f32 %v1059_v29, %v1063_v40 }
 0x848   :  { %v1069_v44 = vmul.f32 1.442695, %v1067_v41 }
 0x84a   :  { %4655 = vpow2.f32 %v1069_v44 }
 0x852   :  { %v1066_v46 = vpop.xlane.xlu1 %1065 }
 0x853   :  { %v1068_v47 = vsub.f32 %v1060_v38, %v1066_v46 }
 0x854   :  { %v4656_v50 = vpop.eup %4655 }
 0x855   :  { %v1073_v51 = vsel %vm231_vm2, %v4656_v50, 0.0  ;;  %v1071_v48 = vmul.f32 1.442695, %v1068_v47  ;;  %v57_v47 = vld [vmem:[%s5640_s3 + $0x18] sm:$0xff] }
 0x856   :  { %1074 = vadd.xlane.f32.xlu0 %v1073_v51  ;;  %v1160_v53 = vpop.permute.xlu1 %1159 }
 0x857   :  { %4255 = vmatpush3.msra.mxu1 %v1160_v53  ;;  %4657 = vpow2.f32 %v1071_v48  ;;  %v56_v53 = vld [vmem:[%s5640_s3 + $0x10] sm:$0xff] }
 0x858   :  { %4264 = vmatprep.subr.mxu1 %v4799_v43  ;;  %v4507_v48 = vpack.c.bf16 %v57_v47, %v56_v53 }
 0x85a   :  { %v1238_v61 = vpop.permute.xlu1 %1237 }
 0x85e   :  { %v1316_v2 = vpop.permute.xlu1 %1315 }
 0x861   :  { %v4658_v54 = vpop.eup %4657 }
 0x862   :  { %v1076_v55 = vsel %vm231_vm2, %v4658_v54, 0.0  ;;  %v1314_v4 = vpop.permute.xlu1 %1313 }
 0x86c   :  { %1083 = vrot.lane.b32.xlu0 %v4984_v9, %s4808_s23 }
 0x88b   :  { %1077 = vadd.xlane.f32.xlu0 %v1076_v55 }
 0x8a1   :  { %1235 = vrot.lane.b32.xlu0 %v4953_v52, %s4810_s24 }
 0x8e3   :  { %v1075_v57 = vpop.xlane.xlu0 %1074 }
 0x8e4   :  { %4659 = vrcp.f32 %v1075_v57 }
 0x8e7   :  { %v1084_v58 = vpop.permute.xlu0 %1083 }
 0x8e8   :  { %4250 = vmatpush3.msra.mxu0 %v1084_v58 }
 0x8e9   :  { %4259 = vmatprep.subr.mxu0 %v4799_v43 }
 0x8ee   :  { %v4660_v59 = vpop.eup %4659 }
 0x8ef   :  { %v1081_v60 = vmul.f32 %v4660_v59, %v4656_v50  ;;  %v55_v50 = vld [vmem:[%s5640_s3 + $0x8] sm:$0xff] }
 0x8f1   :  { %4252 = vmatmul.mubr.msk.f32.vlgmr.msra.gmra.mrb[6].mxu0 %vm231_vm2, %v1081_v60 }
 0x8f2   :  { %4260 = vmatpush3.xpose.msk.msra.mxu0 %vm231_vm2, %v1238_v61  ;;  %4261 = vmatprep.mubr.msk.f32.mxu0 %vm4800_vm1, %v4799_v43 }
 0x8f3   :  { %4269 = vmatprep.subr.mxu0 %v4799_v43 }
 0x918   :  { %v1078_v62 = vpop.xlane.xlu0 %1077 }
 0x919   :  { %4661 = vrcp.f32 %v1078_v62 }
 0x91c   :  { %v1236_v52 = vpop.permute.xlu0 %1235 }
 0x91d   :  { %4262 = vmatmul.mubr.msk.f32.vlgmr.msra.gmra.mrb[8].mxu0 %vm231_vm2, %v1236_v52 }
 0x91e   :  { %4271 = vmatprep.mubr.msk.f32.mxu0 %vm4800_vm1, %v4799_v43 }
 0x923   :  { %v4662_v63 = vpop.eup %4661 }
 0x924   :  { %v1082_v3 = vmul.f32 %v4662_v63, %v4658_v54 }
 0x926   :  { %4257 = vmatmul.mubr.msk.f32.vlgmr.msra.gmra.mrb[16].mxu1 %vm231_vm2, %v1082_v3 }
 0x927   :  { %4265 = vmatpush3.xpose.msk.msra.mxu1 %vm231_vm2, %v1316_v2  ;;  %4266 = vmatprep.mubr.msk.f32.mxu1 %vm4800_vm1, %v4799_v43 }
 0x928   :  { %4274 = vmatprep.subr.mxu1 %v4799_v43 }
 0x92a   :  { %4267 = vmatmul.mubr.msk.f32.vlgmr.msra.gmra.mrb[18].mxu1 %vm231_vm2, %v1314_v4 }
 0x92b   :  { %4276 = vmatprep.mubr.msk.f32.mxu1 %vm4800_vm1, %v4799_v43 }
 0x9c4   :  { %v1155_v6 = vpop.f32.mrb[6].mxu0 }
 0x9c5   :  { %v4253_v7 = vpop.f32.mrb[7].mxu0 }
 0x9f0   :  { %v1309_v8 = vpop.f32.mrb[8].mxu0 }
 0x9f1   :  { %v1391_v11 = vmul.f32 0.35355338, %v1309_v8  ;;  %v4263_v12 = vpop.f32.mrb[9].mxu0 }
 0x9f3   :  { %v1393_v13 = vsel %vm4969_vm3, %v1391_v11, -1e+30 }
 0x9f4   :  { %v1395_v14 = vsel %vm231_vm2, %v1393_v13, -inf }
 0x9f5   :  { %1396 = vmax.xlane.f32.xlu0 %v1395_v14 }
 0x9f9   :  { %v1231_v15 = vpop.f32.mrb[16].mxu1 }
 0x9fa   :  { %v4258_v16 = vpop.f32.mrb[17].mxu1 }
 0x9fd   :  { %v1387_v17 = vpop.f32.mrb[18].mxu1 }
 0x9fe   :  { %v1392_v18 = vmul.f32 0.35355338, %v1387_v17  ;;  %v4268_v19 = vpop.f32.mrb[19].mxu1 }
 0xa00   :  { %v1394_v20 = vsel %vm4969_vm3, %v1392_v18, -1e+30 }
 0xa01   :  { %v1398_v25 = vsel %vm231_vm2, %v1394_v20, -inf }
 0xa02   :  { %1399 = vmax.xlane.f32.xlu1 %v1398_v25 }
 0xa13   :  { %1493 = vrot.lane.b32.xlu1 %v4986_v10, %s4811_s1 }
 0xa17   :  { %1571 = vrot.lane.b32.xlu1 %v5062_v24, %s4812_s25 }
 0xa1b   :  { %1573 = vrot.lane.b32.xlu1 %v5067_v33, %s4812_s25 }
 0xa1f   :  { %1581 = vrot.lane.b32.xlu1 %v1231_v15, %s5649_s26 }
 0xa82   :  { %v1397_v26 = vpop.xlane.xlu0 %1396 }
 0xa83   :  { %v1401_v27 = vsub.f32 %v1393_v13, %v1397_v26 }
 0xa85   :  { %v1403_v28 = vmul.f32 1.442695, %v1401_v27 }
 0xa87   :  { %4663 = vpow2.f32 %v1403_v28 }
 0xa8f   :  { %v1400_v29 = vpop.xlane.xlu1 %1399 }
 0xa90   :  { %v1402_v30 = vsub.f32 %v1394_v20, %v1400_v29 }
 0xa91   :  { %v4664_v34 = vpop.eup %4663 }
 0xa92   :  { %v1405_v35 = vmul.f32 1.442695, %v1402_v30  ;;  %v1407_v10 = vsel %vm231_vm2, %v4664_v34, 0.0 }
 0xa93   :  { %1408 = vadd.xlane.f32.xlu0 %v1407_v10  ;;  %v1494_v36 = vpop.permute.xlu1 %1493 }
 0xa94   :  { %4665 = vpow2.f32 %v1405_v35  ;;  %4275 = vmatpush3.msra.mxu1 %v1494_v36  ;;  %v59_v35 = vld [vmem:[%s5641_s4 + $0x8] sm:$0xff]  ;;  %v60_v36 = vld [vmem:[%s5641_s4 + $0x10] sm:$0xff] }
 0xa97   :  { %v1572_v59 = vpop.permute.xlu1 %1571 }
 0xa98   :  { %v1593_v62 = vsel %vm231_vm2, %v5023_v42, %v1572_v59  ;;  %v1686_v42 = vsub.s32 5, %v4912_v21 }
 0xa9a   :  { %v1687_v11 = vrot.slane %v4918_v23, %v1686_v42 }
 0xa9b   :  { %v1574_v61 = vpop.permute.xlu1 %1573 }
 0xa9c   :  { %v1594_v4 = vsel %vm231_vm2, %v5025_v45, %v1574_v61  ;;  %v63_v61 = vld [vmem:[%s5642_s5 + $0x8] sm:$0xff] }
 0xa9e   :  { %v4666_v24 = vpop.eup %4665 }
 0xa9f   :  { %v1410_v33 = vsel %vm231_vm2, %v4666_v24, 0.0  ;;  %v1582_v3 = vpop.permute.xlu1 %1581 }
 0xaa0   :  { %1411 = vadd.xlane.f32.xlu0 %v1410_v33 }
 0xab6   :  { %1417 = vrot.lane.b32.xlu0 %v4984_v9, %s4811_s1  ;;  %v54_v9 = vld [vmem:[%s5640_s3] sm:$0xff] }
 0xab7   :  { %v4503_v51 = vpack.c.bf16 %v55_v50, %v54_v9  ;;  %v1724_v9 = vsub.s32 7, %v4912_v21 }
 0xab9   :  { %v1725_v47 = vrot.slane %v4918_v23, %v1724_v9 }
 0xaba   :  { %1579 = vrot.lane.b32.xlu0 %v1155_v6, %s5649_s26  ;;  %v1597_v6 = vsel %vm1595_vm5, %v1594_v4, %v1582_v3  ;;  %v67_v3 = vld [vmem:[%s5642_s5 + $0x28] sm:$0xff]  ;;  %s3819_s26 = sld [smem:[#allocation3]] }
 0xac0   :  { %s3820_s28 = scalar_lea.vmem [#allocation4], %s3819_s26 }
 0xb20   :  { %v1409_v37 = vpop.xlane.xlu0 %1408 }
 0xb21   :  { %4667 = vrcp.f32 %v1409_v37 }
 0xb2b   :  { %v4668_v39 = vpop.eup %4667 }
 0xb2c   :  { %v1415_v40 = vmul.f32 %v4668_v39, %v4664_v34  ;;  %v58_v34 = vld [vmem:[%s5641_s4] sm:$0xff] }
 0xb2d   :  { %v1412_v38 = vpop.xlane.xlu0 %1411  ;;  %v4511_v10 = vpack.c.bf16 %v59_v35, %v58_v34 }
 0xb2e   :  { %4669 = vrcp.f32 %v1412_v38 }
 0xb2f   :  { %4512 = vmatprep.subr.bf16.mxu1 %v4511_v10 }
 0xb31   :  { %v1418_v41 = vpop.permute.xlu0 %1417 }
 0xb32   :  { %4270 = vmatpush3.msra.mxu0 %v1418_v41 }
 0xb33   :  { %4272 = vmatmul.mubr.msk.f32.vlgmr.msra.gmra.mrb[10].mxu0 %vm231_vm2, %v1415_v40  ;;  %4504 = vmatprep.subr.bf16.mxu0 %v4503_v51 }
 0xb34   :  { %4506 = vmatpush3.bf16.msra.mxu0 %v4503_v51 }
 0xb35   :  { %4508 = vmatprep.subr.bf16.mxu0 %v4507_v48  ;;  %v1580_v60 = vpop.permute.xlu0 %1579 }
 0xb36   :  { %v1596_v52 = vsel %vm1595_vm5, %v1593_v62, %v1580_v60  ;;  %v62_v60 = vld [vmem:[%s5642_s5] sm:$0xff] }
 0xb37   :  { %v4519_v62 = vpack.c.bf16 %v63_v61, %v62_v60 }
 0xb38   :  { %v4670_v44 = vpop.eup %4669  ;;  %4510 = vmatpush3.bf16.msra.mxu0 %v4507_v48 }
 0xb39   :  { %v1416_v46 = vmul.f32 %v4670_v44, %v4666_v24  ;;  %v61_v24 = vld [vmem:[%s5641_s4 + $0x18] sm:$0xff]  ;;  %4520 = vmatprep.subr.bf16.mxu0 %v4519_v62 }
 0xb3a   :  { %v4515_v33 = vpack.c.bf16 %v61_v24, %v60_v36 }
 0xb3b   :  { %4277 = vmatmul.mubr.msk.f32.vlgmr.msra.gmra.mrb[20].mxu1 %vm231_vm2, %v1416_v46  ;;  %v1718_v46 = vsub.s32 6, %v4912_v21  ;;  %v3990_v21 = vld [vmem:[%s5642_s5 + $0x88] sm:$0xff] }
 0xb3c   :  { %4514 = vmatpush3.bf16.msra.mxu1 %v4511_v10 }
 0xb3d   :  { %4516 = vmatprep.subr.bf16.mxu1 %v4515_v33  ;;  %v1719_v50 = vrot.slane %v4918_v23, %v1718_v46  ;;  %v64_v23 = vld [vmem:[%s5642_s5 + $0x10] sm:$0xff] }
 0xb40   :  { %4518 = vmatpush3.bf16.msra.mxu1 %v4515_v33 }
 0xc06   :  { %v1489_v54 = vpop.f32.mrb[10].mxu0 }
 0xc07   :  { %1587 = vrot.lane.b32.xlu0 %v1489_v54, %s5651_s27  ;;  %v4273_v55 = vpop.f32.mrb[11].mxu0 }
 0xc0e   :  { %v1565_v57 = vpop.f32.mrb[20].mxu1 }
 0xc0f   :  { %1589 = vrot.lane.b32.xlu1 %v1565_v57, %s5651_s27  ;;  %v4278_v58 = vpop.f32.mrb[21].mxu1  ;;  %s4044_s27 = sld [smem:[#allocation3 + $0x1]] }
 0xc79   :  { %v1588_v63 = vpop.permute.xlu0 %1587 }
 0xc7a   :  { %v1599_v2 = vsel %vm1598_vm4, %v1596_v52, %v1588_v63  ;;  %v65_v52 = vld [vmem:[%s5642_s5 + $0x18] sm:$0xff] }
 0xc7b   :  { %4287 = vmatprep.mubr.msk.f32.mxu0 %vm81_vm0, %v1599_v2  ;;  %v4523_v63 = vpack.c.bf16 %v65_v52, %v64_v23  ;;  %v66_v2 = vld [vmem:[%s5642_s5 + $0x20] sm:$0xff] }
 0xc7c   :  { %v4527_v4 = vpack.c.bf16 %v67_v3, %v66_v2  ;;  %v3977_v3 = vld [vmem:[%s5639_s2 + $0x20] sm:$0xff] }
 0xc81   :  { %v1590_v7 = vpop.permute.xlu1 %1589 }
 0xc82   :  { %v1600_v8 = vsel %vm1598_vm4, %v1597_v6, %v1590_v7  ;;  %v68_v6 = vld [vmem:[%s5642_s5 + $0x30] sm:$0xff]  ;;  %v69_v7 = vld [vmem:[%s5642_s5 + $0x38] sm:$0xff] }
 0xc83   :  { %4288 = vmatmul.mubr.msk.f32.vlgmr.msra.gmra.mrb[12].mxu0 %vm81_vm0, %v1600_v8  ;;  %v4531_v8 = vpack.c.bf16 %v69_v7, %v68_v6  ;;  %v3979_v7 = vld [vmem:[%s5639_s2 + $0x30] sm:$0xff] }
 0xc84   :  { %4522 = vmatpush3.bf16.msra.mxu0 %v4519_v62 }
 0xc85   :  { %4524 = vmatprep.subr.bf16.mxu0 %v4523_v63 }
 0xc88   :  { %4526 = vmatpush3.bf16.msra.mxu0 %v4523_v63 }
 0xc89   :  { %4528 = vmatprep.subr.bf16.mxu0 %v4527_v4 }
 0xc8c   :  { %4530 = vmatpush3.bf16.msra.mxu0 %v4527_v4  ;;  %v3978_v4 = vld [vmem:[%s5639_s2 + $0x28] sm:$0xff] }
 0xc8d   :  { %4532 = vmatprep.subr.bf16.mxu0 %v4531_v8  ;;  %v4551_v6 = vpack.c.bf16 %v3978_v4, %v3977_v3 }
 0xc8f   :  { %4552 = vmatprep.subr.bf16.mxu1 %v4551_v6 }
 0xc90   :  { %4534 = vmatpush3.bf16.msra.mxu0 %v4531_v8  ;;  %v3980_v8 = vld [vmem:[%s5639_s2 + $0x38] sm:$0xff]  ;;  %s5655_s2 = smov 16  }
 0xd56   :  { %v4289_v12 = vpop.f32.mrb[12].mxu0 }
 0xd57   :  { %v1683_v13 = vadd.f32 %v4289_v12, %v4890_v1  ;;  %v1673_v14 = vpop.f32.mrb[13].mxu0  ;;  %v71_v12 = vld [vmem:[%s5642_s5 + $0x48] sm:$0xff] }
 0xd58   :  { %v1682_v15 = vadd.f32 %v1673_v14, %v4885_v0  ;;  %v72_v14 = vld [vmem:[%s5642_s5 + $0x50] sm:$0xff] }
 0xd59   :  { %v5154_v45 = vadd.f32 %v1687_v11, %v1683_v13 }
 0xd5a   :  { %v5156_v16 = vadd.f32 %v1687_v11, %v1682_v15  ;;  %v70_v11 = vld [vmem:[%s5642_s5 + $0x40] sm:$0xff]  ;;  %v73_v15 = vld [vmem:[%s5642_s5 + $0x58] sm:$0xff] }
 0xd5b   :  { %v1693_v17 = vsel %vm81_vm0, %v5154_v45, 0.0  ;;  %v4535_v13 = vpack.c.bf16 %v71_v12, %v70_v11  ;;  %v4555_v11 = vpack.c.bf16 %v3980_v8, %v3979_v7  ;;  %v5274_v12 = vld [vmem:[%s5643_s6 + $0x10] sm:$0xff] }
 0xd5c   :  { %1694 = vadd.xlane.f32.xlu1 %v1693_v17  ;;  %v1690_v18 = vsel %vm81_vm0, %v5156_v16, 0.0  ;;  %v4539_v17 = vpack.c.bf16 %v73_v15, %v72_v14 }
 0xd5d   :  { %1691 = vadd.xlane.f32.xlu0 %v1690_v18  ;;  %4536 = vmatprep.subr.bf16.mxu0 %v4535_v13  ;;  %v74_v18 = vld [vmem:[%s5642_s5 + $0x60] sm:$0xff] }
 0xd5e   :  { %4538 = vmatpush3.bf16.msra.mxu0 %v4535_v13  ;;  %v2079_v13 = vrot.slane %v5274_v12, %v210_v22  ;;  %v1986_v22 = vrot.slane %v5274_v12, %v117_v32 }
 0xd5f   :  { %4540 = vmatprep.subr.bf16.mxu0 %v4539_v17 }
 0xd62   :  { %4542 = vmatpush3.bf16.msra.mxu0 %v4539_v17 }
 0xde9   :  { %v1695_v19 = vpop.xlane.xlu1 %1694 }
 0xdea   :  { %v1697_v20 = vmul.f32 0.03125, %v1695_v19  ;;  %v1692_v25 = vpop.xlane.xlu0 %1691  ;;  %v75_v19 = vld [vmem:[%s5642_s5 + $0x68] sm:$0xff] }
 0xdeb   :  { %v1696_v26 = vmul.f32 0.03125, %v1692_v25  ;;  %v76_v25 = vld [vmem:[%s5642_s5 + $0x70] sm:$0xff] }
 0xdec   :  { %v1699_v1 = vsub.f32 %v5154_v45, %v1697_v20  ;;  %v4543_v20 = vpack.c.bf16 %v75_v19, %v74_v18 }
 0xded   :  { %v1698_v0 = vsub.f32 %v5156_v16, %v1696_v26  ;;  %v77_v26 = vld [vmem:[%s5642_s5 + $0x78] sm:$0xff] }
 0xdee   :  { %v1701_v29 = vmul.f32 %v1699_v1, %v1699_v1  ;;  %4544 = vmatprep.subr.bf16.mxu0 %v4543_v20 }
 0xdef   :  { %v1700_v27 = vmul.f32 %v1698_v0, %v1698_v0  ;;  %4546 = vmatpush3.bf16.msra.mxu0 %v4543_v20 }
 0xdf0   :  { %v1705_v30 = vsel %vm81_vm0, %v1701_v29, 0.0 }
 0xdf1   :  { %v1702_v28 = vsel %vm81_vm0, %v1700_v27, 0.0 }
 0xdf2   :  { %1703 = vadd.xlane.f32.xlu0 %v1702_v28 }
 0xdf6   :  { %1706 = vadd.xlane.f32.xlu0 %v1705_v30 }
 0xe7f   :  { %v1704_v37 = vpop.xlane.xlu0 %1703 }
 0xe80   :  { %v1708_v38 = vmul.f32 0.03125, %v1704_v37 }
 0xe82   :  { %v1710_v39 = vadd.f32 1e-05, %v1708_v38 }
 0xe83   :  { %v1707_v40 = vpop.xlane.xlu0 %1706 }
 0xe84   :  { %4671 = vrsqrt.f32 %v1710_v39  ;;  %v1709_v41 = vmul.f32 0.03125, %v1707_v40 }
 0xe86   :  { %v1711_v44 = vadd.f32 1e-05, %v1709_v41 }
 0xe88   :  { %4673 = vrsqrt.f32 %v1711_v44 }
 0xe8e   :  { %v4672_v51 = vpop.eup %4671 }
 0xe8f   :  { %v1714_v53 = vmul.f32 %v4672_v51, %v1698_v0  ;;  %v3971_v0 = vld [vmem:[%s5644_s7] ss:$0 sm:$0xff] }
 0xe91   :  { %v1720_v48 = vmul.f32 %v1719_v50, %v1714_v53 }
 0xe92   :  { %v4674_v54 = vpop.eup %4673 }
 0xe93   :  { %v1715_v55 = vmul.f32 %v4674_v54, %v1699_v1  ;;  %v1726_v57 = vadd.f32 %v1725_v47, %v1720_v48  ;;  %v4547_v1 = vpack.c.bf16 %v77_v26, %v76_v25  ;;  %v1980_v25 = vrot.slane %v5274_v12, %v111_v31 }
 0xe95   :  { %v1721_v58 = vmul.f32 %v1719_v50, %v1715_v55  ;;  %4298 = vmatprep.mubr.msk.f32.mxu1 %vm81_vm0, %v1726_v57  ;;  %4548 = vmatprep.subr.bf16.mxu0 %v4547_v1  ;;  %v3976_v50 = vld [vmem:[%s5643_s6 + $0x8] ss:$0 sm:$0xff] }
 0xe96   :  { %4550 = vmatpush3.bf16.msra.mxu0 %v4547_v1 }
 0xe97   :  { %v1727_v59 = vadd.f32 %v1725_v47, %v1721_v58  ;;  %4377 = vmatprep.subr.mxu0 %v4799_v43 }
 0xe99   :  { %4299 = vmatmul.mubr.msk.f32.vlgmr.msra.gmra.mrb[22].mxu1 %vm81_vm0, %v1727_v59 }
 0xe9a   :  { %4554 = vmatpush3.bf16.msra.mxu1 %v4551_v6 }
 0xe9b   :  { %4556 = vmatprep.subr.bf16.mxu1 %v4555_v11 }
 0xe9e   :  { %4558 = vmatpush3.bf16.msra.mxu1 %v4555_v11 }
 0xe9f   :  { %4347 = vmatprep.subr.mxu1 %v4799_v43 }
 0xf6c   :  { %v4300_v27 = vpop.f32.mrb[22].mxu1 }
 0xf6d   :  { %v1812_v28 = vadd.f32 %v4300_v27, %v3971_v0  ;;  %v1806_v29 = vpop.f32.mrb[23].mxu1 }
 0xf6e   :  { %v1807_v30 = vadd.f32 %v3971_v0, %v1806_v29 }
 0xf6f   :  { %v3975_v34 = vmul.f32 -1.702, %v1812_v28 }
 0xf70   :  { %v3974_v35 = vmul.f32 -1.702, %v1807_v30 }
 0xf71   :  { %v1821_v10 = vmul.f32 1.442695, %v3975_v34 }
 0xf72   :  { %v1819_v36 = vmul.f32 1.442695, %v3974_v35 }
 0xf73   :  { %4675 = vpow2.f32 %v1821_v10 }
 0xf74   :  { %4677 = vpow2.f32 %v1819_v36 }
 0xf7d   :  { %v4676_v24 = vpop.eup %4675 }
 0xf7e   :  { %v4678_v33 = vpop.eup %4677  ;;  %v1824_v37 = vadd.f32 1.0, %v4676_v24  ;;  %v2073_v24 = vrot.slane %v5274_v12, %v204_v49 }
 0xf7f   :  { %v1823_v38 = vadd.f32 1.0, %v4678_v33 }
 0xf80   :  { %4679 = vrcp.f32 %v1824_v37 }
 0xf81   :  { %4681 = vrcp.f32 %v1823_v38 }
 0xf8a   :  { %v4680_v39 = vpop.eup %4679 }
 0xf8b   :  { %v4682_v40 = vpop.eup %4681  ;;  %v1830_v44 = vmul.f32 %v4680_v39, %v1812_v28 }
 0xf8c   :  { %v1829_v41 = vmul.f32 %v4682_v40, %v1807_v30 }
 0xf8e   :  { %4333 = vmatprep.mubr.f32.mxu0 %v1829_v41 }
 0xf8f   :  { %4334 = vmatmul.mubr.f32.vlgmr.msra.gmra.mrb[14].mxu0 %v1830_v44 }
 0xf90   :  { %4379 = vmatprep.mubr.msk.f32.mxu0 %vm4800_vm1, %v4799_v43 }
0x1062   :  { %v4335_v51 = vpop.f32.mrb[14].mxu0 }
0x1063   :  { %v1907_v53 = vadd.f32 %v4335_v51, %v5154_v45  ;;  %v1897_v47 = vpop.f32.mrb[15].mxu0 }
0x1064   :  { %v1906_v48 = vadd.f32 %v1897_v47, %v5156_v16 }
0x1065   :  { %v5247_v54 = vadd.f32 %v3976_v50, %v1907_v53 }
0x1066   :  { %v5249_v55 = vadd.f32 %v3976_v50, %v1906_v48 }
0x1067   :  { %v1954_v57 = vsel %vm81_vm0, %v5247_v54, 0.0 }
0x1068   :  { %1955 = vadd.xlane.f32.xlu1 %v1954_v57  ;;  %v1951_v58 = vsel %vm81_vm0, %v5249_v55, 0.0 }
0x1069   :  { %1952 = vadd.xlane.f32.xlu0 %v1951_v58  ;;  %v2089_v58 = vrot.slane %v5274_v12, %v220_v5 }
0x10f5   :  { %v1956_v59 = vpop.xlane.xlu1 %1955 }
0x10f6   :  { %v1958_v60 = vmul.f32 0.03125, %v1956_v59  ;;  %v1953_v61 = vpop.xlane.xlu0 %1952 }
0x10f7   :  { %v1957_v62 = vmul.f32 0.03125, %v1953_v61 }
0x10f8   :  { %v1960_v45 = vsub.f32 %v5247_v54, %v1958_v60 }
0x10f9   :  { %v1959_v16 = vsub.f32 %v5249_v55, %v1957_v62 }
0x10fa   :  { %v1962_v23 = vmul.f32 %v1960_v45, %v1960_v45 }
0x10fb   :  { %v1961_v52 = vmul.f32 %v1959_v16, %v1959_v16 }
0x10fc   :  { %v1966_v63 = vsel %vm81_vm0, %v1962_v23, 0.0 }
0x10fd   :  { %1967 = vadd.xlane.f32.xlu1 %v1966_v63  ;;  %v1963_v2 = vsel %vm81_vm0, %v1961_v52, 0.0 }
0x10fe   :  { %1964 = vadd.xlane.f32.xlu0 %v1963_v2 }
0x1114   :  { %2081 = vrot.lane.b32.xlu0 %v2079_v13, %s4798_s15 }
0x118a   :  { %v1968_v14 = vpop.xlane.xlu1 %1967 }
0x118b   :  { %v1970_v15 = vmul.f32 0.03125, %v1968_v14  ;;  %v1965_v17 = vpop.xlane.xlu0 %1964 }
0x118c   :  { %v1969_v18 = vmul.f32 0.03125, %v1965_v17 }
0x118d   :  { %v1972_v19 = vadd.f32 1e-05, %v1970_v15 }
0x118e   :  { %v1971_v20 = vadd.f32 1e-05, %v1969_v18 }
0x118f   :  { %4683 = vrsqrt.f32 %v1972_v19  ;;  %v2082_v31 = vpop.permute.xlu0 %2081 }
0x1190   :  { %4685 = vrsqrt.f32 %v1971_v20 }
0x1199   :  { %v4684_v26 = vpop.eup %4683 }
0x119a   :  { %v4686_v1 = vpop.eup %4685  ;;  %v1976_v0 = vmul.f32 %v4684_v26, %v1960_v45 }
0x119b   :  { %v1975_v27 = vmul.f32 %v4686_v1, %v1959_v16 }
0x119c   :  { %v1982_v28 = vmul.f32 %v1980_v25, %v1976_v0 }
0x119d   :  { %v1981_v29 = vmul.f32 %v1980_v25, %v1975_v27 }
0x119e   :  { %v1988_v30 = vadd.f32 %v1986_v22, %v1982_v28 }
0x119f   :  { %v1987_v34 = vadd.f32 %v1986_v22, %v1981_v29 }
0x11a1   :  { %4344 = vmatprep.mubr.msk.f32.mxu1 %vm81_vm0, %v1987_v34 }
0x11a2   :  { %4345 = vmatmul.mubr.msk.f32.vlgmr.msra.gmra.mrb[24].mxu1 %vm81_vm0, %v1988_v30 }
0x11a3   :  { %4349 = vmatprep.mubr.msk.f32.mxu1 %vm4800_vm1, %v4799_v43 }
0x1275   :  { %v4346_v35 = vpop.f32.mrb[24].mxu1 }
0x1276   :  { %v2061_v10 = vpop.f32.mrb[25].mxu1  ;;  %v5295_v32 = vadd.f32 %v4346_v35, %v2082_v31  ;;  %v5311_v39 = vadd.f32 %v4346_v35, %v2073_v24 }
0x1277   :  { %v5291_v36 = vadd.f32 %v2082_v31, %v2061_v10  ;;  %v5303_v37 = vadd.f32 %v2073_v24, %v2061_v10 }
0x1279   :  { %2097 = vrot.lane.b32.xlu1 %v5291_v36, %s4801_s16 }
0x127d   :  { %2175 = vrot.lane.b32.xlu1 %v5295_v32, %s4801_s16 }
0x12eb   :  { %v2098_v33 = vpop.permute.xlu1 %2097 }
0x12ec   :  { %4348 = vmatpush3.xpose.msk.msra.mxu1 %vm231_vm2, %v2098_v33 }
0x12ed   :  { %4352 = vmatprep.subr.mxu1 %v4799_v43 }
0x12ef   :  { %4350 = vmatmul.mubr.msk.f32.vlgmr.msra.gmra.mrb[26].mxu1 %vm231_vm2, %v5303_v37  ;;  %v2176_v38 = vpop.permute.xlu1 %2175 }
0x12f0   :  { %4353 = vmatpush3.xpose.msk.msra.mxu1 %vm231_vm2, %v2176_v38  ;;  %4354 = vmatprep.mubr.msk.f32.mxu1 %vm4800_vm1, %v4799_v43 }
0x12f1   :  { %4357 = vmatprep.subr.mxu1 %v4799_v43 }
0x12f3   :  { %4355 = vmatmul.mubr.msk.f32.vlgmr.msra.gmra.mrb[28].mxu1 %vm231_vm2, %v5311_v39 }
0x12f4   :  { %4359 = vmatprep.mubr.msk.f32.mxu1 %vm4800_vm1, %v4799_v43 }
0x13c2   :  { %v2170_v49 = vpop.f32.mrb[26].mxu1 }
0x13c3   :  { %v2252_v40 = vmul.f32 0.35355338, %v2170_v49  ;;  %v4351_v41 = vpop.f32.mrb[27].mxu1 }
0x13c5   :  { %v2254_v44 = vsel %vm4969_vm3, %v2252_v40, -1e+30 }
0x13c6   :  { %v2248_v50 = vpop.f32.mrb[28].mxu1  ;;  %v2256_v51 = vsel %vm231_vm2, %v2254_v44, -inf }
0x13c7   :  { %v2253_v53 = vmul.f32 0.35355338, %v2248_v50  ;;  %2257 = vmax.xlane.f32.xlu1 %v2256_v51  ;;  %v4356_v47 = vpop.f32.mrb[29].mxu1 }
0x13c9   :  { %v2255_v48 = vsel %vm4969_vm3, %v2253_v53, -1e+30 }
0x13ca   :  { %v2259_v57 = vsel %vm231_vm2, %v2255_v48, -inf }
0x13cb   :  { %2260 = vmax.xlane.f32.xlu0 %v2259_v57 }
0x13e1   :  { %2091 = vrot.lane.b32.xlu0 %v2089_v58, %s4802_s17 }
0x1454   :  { %v2258_v5 = vpop.xlane.xlu1 %2257 }
0x1455   :  { %v2262_v45 = vsub.f32 %v2254_v44, %v2258_v5 }
0x1457   :  { %v2264_v16 = vmul.f32 1.442695, %v2262_v45 }
0x1458   :  { %v2261_v59 = vpop.xlane.xlu0 %2260 }
0x1459   :  { %4687 = vpow2.f32 %v2264_v16  ;;  %v2263_v63 = vsub.f32 %v2255_v48, %v2261_v59 }
0x145b   :  { %v2266_v2 = vmul.f32 1.442695, %v2263_v63 }
0x145c   :  { %v2092_v60 = vpop.permute.xlu0 %2091 }
0x145d   :  { %v5328_v61 = vadd.f32 %v2092_v60, %v2061_v10  ;;  %v5330_v62 = vadd.f32 %v4346_v35, %v2092_v60  ;;  %4689 = vpow2.f32 %v2266_v2 }
0x145f   :  { %2356 = vrot.lane.b32.xlu0 %v5330_v62, %s4802_s17  ;;  %2279 = vrot.lane.b32.xlu1 %v5328_v61, %s4802_s17 }
0x1463   :  { %2434 = vrot.lane.b32.xlu0 %v5291_v36, %s4803_s18  ;;  %v4688_v23 = vpop.eup %4687 }
0x1464   :  { %v2268_v52 = vsel %vm231_vm2, %v4688_v23, 0.0 }
0x1467   :  { %2512 = vrot.lane.b32.xlu0 %v5295_v32, %s4803_s18  ;;  %v4690_v3 = vpop.eup %4689 }
0x1468   :  { %v2271_v4 = vsel %vm231_vm2, %v4690_v3, 0.0 }
0x1483   :  { %2269 = vadd.xlane.f32.xlu1 %v2268_v52 }
0x1494   :  { %2432 = vrot.lane.b32.xlu1 %v5303_v37, %s4804_s19 }
0x14b8   :  { %2272 = vadd.xlane.f32.xlu1 %v2271_v4 }
0x14c9   :  { %2510 = vrot.lane.b32.xlu1 %v5311_v39, %s4804_s19 }
0x14d1   :  { %v2280_v6 = vpop.permute.xlu1 %2279  ;;  %v2357_v13 = vpop.permute.xlu0 %2356 }
0x14d2   :  { %4358 = vmatpush3.msra.mxu1 %v2280_v6 }
0x14d3   :  { %4362 = vmatprep.subr.mxu1 %v4799_v43 }
0x14d5   :  { %v2435_v18 = vpop.permute.xlu0 %2434 }
0x14d9   :  { %v2513_v20 = vpop.permute.xlu0 %2512 }
0x1510   :  { %v2270_v7 = vpop.xlane.xlu1 %2269 }
0x1511   :  { %4691 = vrcp.f32 %v2270_v7 }
0x1514   :  { %v2433_v14 = vpop.permute.xlu1 %2432 }
0x151b   :  { %v4692_v8 = vpop.eup %4691 }
0x151c   :  { %v2276_v11 = vmul.f32 %v4692_v8, %v4688_v23 }
0x151e   :  { %4360 = vmatmul.mubr.msk.f32.vlgmr.msra.gmra.mrb[30].mxu1 %vm231_vm2, %v2276_v11 }
0x151f   :  { %4363 = vmatpush3.msra.mxu1 %v2357_v13  ;;  %4364 = vmatprep.mubr.msk.f32.mxu1 %vm4800_vm1, %v4799_v43 }
0x1520   :  { %4367 = vmatprep.subr.mxu1 %v4799_v43 }
0x1545   :  { %v2273_v15 = vpop.xlane.xlu1 %2272 }
0x1546   :  { %4693 = vrcp.f32 %v2273_v15 }
0x1549   :  { %v2511_v25 = vpop.permute.xlu1 %2510 }
0x1550   :  { %v4694_v17 = vpop.eup %4693 }
0x1551   :  { %v2277_v19 = vmul.f32 %v4694_v17, %v4690_v3 }
0x1553   :  { %4365 = vmatmul.mubr.msk.f32.vlgmr.msra.gmra.mrb[32].mxu1 %vm231_vm2, %v2277_v19 }
0x1554   :  { %4368 = vmatpush3.xpose.msk.msra.mxu1 %vm231_vm2, %v2435_v18  ;;  %4369 = vmatprep.mubr.msk.f32.mxu1 %vm4800_vm1, %v4799_v43 }
0x1555   :  { %4372 = vmatprep.subr.mxu1 %v4799_v43 }
0x1557   :  { %4370 = vmatmul.mubr.msk.f32.vlgmr.msra.gmra.mrb[34].mxu1 %vm231_vm2, %v2433_v14 }
0x1558   :  { %4373 = vmatpush3.xpose.msk.msra.mxu1 %vm231_vm2, %v2513_v20  ;;  %4374 = vmatprep.mubr.msk.f32.mxu1 %vm4800_vm1, %v4799_v43 }
0x1559   :  { %4382 = vmatprep.subr.mxu1 %v4799_v43 }
0x155b   :  { %4375 = vmatmul.mubr.msk.f32.vlgmr.msra.gmra.mrb[36].mxu1 %vm231_vm2, %v2511_v25 }
0x155c   :  { %4384 = vmatprep.mubr.msk.f32.mxu1 %vm4800_vm1, %v4799_v43 }
0x15f1   :  { %v5364_v26 = vpop.f32.mrb[30].mxu1 }
0x15f2   :  { %v4361_v1 = vpop.f32.mrb[31].mxu1 }
0x1626   :  { %v5366_v22 = vpop.f32.mrb[32].mxu1 }
0x1627   :  { %v4366_v0 = vpop.f32.mrb[33].mxu1 }
0x162a   :  { %v2506_v27 = vpop.f32.mrb[34].mxu1 }
0x162b   :  { %v2588_v28 = vmul.f32 0.35355338, %v2506_v27  ;;  %v4371_v29 = vpop.f32.mrb[35].mxu1 }
0x162d   :  { %v2590_v30 = vsel %vm4969_vm3, %v2588_v28, -1e+30 }
0x162e   :  { %v2584_v34 = vpop.f32.mrb[36].mxu1  ;;  %v2592_v31 = vsel %vm231_vm2, %v2590_v30, -inf }
0x162f   :  { %v2589_v35 = vmul.f32 0.35355338, %v2584_v34  ;;  %2593 = vmax.xlane.f32.xlu0 %v2592_v31  ;;  %v4376_v10 = vpop.f32.mrb[37].mxu1 }
0x1631   :  { %v2591_v24 = vsel %vm4969_vm3, %v2589_v35, -1e+30 }
0x1632   :  { %v2595_v33 = vsel %vm231_vm2, %v2591_v24, -inf }
0x1633   :  { %2596 = vmax.xlane.f32.xlu1 %v2595_v33 }
0x1644   :  { %2690 = vrot.lane.b32.xlu1 %v5330_v62, %s4805_s20 }
0x1645   :  { %2614 = vrot.lane.b32.xlu0 %v5328_v61, %s4805_s20 }
0x1648   :  { %2768 = vrot.lane.b32.xlu1 %v5291_v36, %s4806_s21 }
0x164c   :  { %2846 = vrot.lane.b32.xlu1 %v5295_v32, %s4806_s21 }
0x1650   :  { %2844 = vrot.lane.b32.xlu1 %v5311_v39, %s4807_s22 }
0x16bc   :  { %v2594_v38 = vpop.xlane.xlu0 %2593 }
0x16bd   :  { %v2598_v49 = vsub.f32 %v2590_v30, %v2594_v38 }
0x16bf   :  { %v2600_v40 = vmul.f32 1.442695, %v2598_v49 }
0x16c0   :  { %v2615_v41 = vpop.permute.xlu0 %2614  ;;  %v2597_v44 = vpop.xlane.xlu1 %2596 }
0x16c1   :  { %4695 = vpow2.f32 %v2600_v40  ;;  %v2599_v50 = vsub.f32 %v2591_v24, %v2597_v44  ;;  %4378 = vmatpush3.msra.mxu0 %v2615_v41 }
0x16c2   :  { %4387 = vmatprep.subr.mxu0 %v4799_v43 }
0x16c3   :  { %v2602_v51 = vmul.f32 1.442695, %v2599_v50 }
0x16c4   :  { %v2691_v53 = vpop.permute.xlu1 %2690 }
0x16c5   :  { %4697 = vpow2.f32 %v2602_v51  ;;  %4383 = vmatpush3.msra.mxu1 %v2691_v53 }
0x16c6   :  { %4392 = vmatprep.subr.mxu1 %v4799_v43 }
0x16c8   :  { %v2769_v5 = vpop.permute.xlu1 %2768 }
0x16cb   :  { %v4696_v47 = vpop.eup %4695 }
0x16cc   :  { %v2604_v48 = vsel %vm231_vm2, %v4696_v47, 0.0  ;;  %v2847_v52 = vpop.permute.xlu1 %2846 }
0x16cd   :  { %2605 = vadd.xlane.f32.xlu0 %v2604_v48 }
0x16cf   :  { %v4698_v57 = vpop.eup %4697 }
0x16d0   :  { %v2607_v58 = vsel %vm231_vm2, %v4698_v57, 0.0  ;;  %v2845_v3 = vpop.permute.xlu1 %2844 }
0x16d1   :  { %2608 = vadd.xlane.f32.xlu0 %v2607_v58 }
0x16e7   :  { %2766 = vrot.lane.b32.xlu0 %v5303_v37, %s4807_s22 }
0x175a   :  { %v2606_v59 = vpop.xlane.xlu0 %2605 }
0x175b   :  { %4699 = vrcp.f32 %v2606_v59 }
0x175e   :  { %v2609_v60 = vpop.xlane.xlu0 %2608 }
0x175f   :  { %4701 = vrcp.f32 %v2609_v60 }
0x1762   :  { %v2767_v2 = vpop.permute.xlu0 %2766 }
0x1765   :  { %v4700_v45 = vpop.eup %4699 }
0x1766   :  { %v2612_v16 = vmul.f32 %v4700_v45, %v4696_v47 }
0x1768   :  { %4380 = vmatmul.mubr.msk.f32.vlgmr.msra.gmra.mrb[16].mxu0 %vm231_vm2, %v2612_v16 }
0x1769   :  { %v4702_v23 = vpop.eup %4701  ;;  %4388 = vmatpush3.xpose.msk.msra.mxu0 %vm231_vm2, %v2769_v5  ;;  %4389 = vmatprep.mubr.msk.f32.mxu0 %vm4800_vm1, %v4799_v43 }
0x176a   :  { %v2613_v63 = vmul.f32 %v4702_v23, %v4698_v57  ;;  %4397 = vmatprep.subr.mxu0 %v4799_v43 }
0x176c   :  { %4385 = vmatmul.mubr.msk.f32.vlgmr.msra.gmra.mrb[38].mxu1 %vm231_vm2, %v2613_v63  ;;  %4390 = vmatmul.mubr.msk.f32.vlgmr.msra.gmra.mrb[18].mxu0 %vm231_vm2, %v2767_v2 }
0x176d   :  { %4393 = vmatpush3.xpose.msk.msra.mxu1 %vm231_vm2, %v2847_v52  ;;  %4394 = vmatprep.mubr.msk.f32.mxu1 %vm4800_vm1, %v4799_v43 }
0x176e   :  { %4402 = vmatprep.subr.mxu1 %v4799_v43  ;;  %4399 = vmatprep.mubr.msk.f32.mxu0 %vm4800_vm1, %v4799_v43 }
0x1770   :  { %4395 = vmatmul.mubr.msk.f32.vlgmr.msra.gmra.mrb[40].mxu1 %vm231_vm2, %v2845_v3 }
0x1771   :  { %4404 = vmatprep.mubr.msk.f32.mxu1 %vm4800_vm1, %v4799_v43 }
0x183b   :  { %v5406_v4 = vpop.f32.mrb[16].mxu0 }
0x183c   :  { %v4381_v6 = vpop.f32.mrb[17].mxu0 }
0x183f   :  { %v5408_v7 = vpop.f32.mrb[38].mxu1  ;;  %v2840_v8 = vpop.f32.mrb[18].mxu0 }
0x1840   :  { %v2922_v11 = vmul.f32 0.35355338, %v2840_v8  ;;  %v4386_v13 = vpop.f32.mrb[39].mxu1  ;;  %v4391_v14 = vpop.f32.mrb[19].mxu0 }
0x1842   :  { %v2924_v15 = vsel %vm4969_vm3, %v2922_v11, -1e+30 }
0x1843   :  { %v2918_v17 = vpop.f32.mrb[40].mxu1  ;;  %v2926_v18 = vsel %vm231_vm2, %v2924_v15, -inf }
0x1844   :  { %v2923_v19 = vmul.f32 0.35355338, %v2918_v17  ;;  %2927 = vmax.xlane.f32.xlu0 %v2926_v18  ;;  %v4396_v20 = vpop.f32.mrb[41].mxu1 }
0x1846   :  { %v2925_v25 = vsel %vm4969_vm3, %v2923_v19, -1e+30 }
0x1847   :  { %v2929_v1 = vsel %vm231_vm2, %v2925_v25, -inf }
0x1848   :  { %2930 = vmax.xlane.f32.xlu1 %v2929_v1 }
0x1859   :  { %3024 = vrot.lane.b32.xlu1 %v5330_v62, %s4808_s23 }
0x185a   :  { %2948 = vrot.lane.b32.xlu0 %v5328_v61, %s4808_s23  ;;  %s5656_s23 = smov 24  }
0x185d   :  { %3102 = vrot.lane.b32.xlu1 %v5291_v36, %s4809_s0 }
0x1861   :  { %3180 = vrot.lane.b32.xlu1 %v5295_v32, %s4809_s0 }
0x1865   :  { %3178 = vrot.lane.b32.xlu1 %v5311_v39, %s4810_s24 }
0x18d1   :  { %v2928_v0 = vpop.xlane.xlu0 %2927 }
0x18d2   :  { %v2932_v27 = vsub.f32 %v2924_v15, %v2928_v0 }
0x18d4   :  { %v2934_v28 = vmul.f32 1.442695, %v2932_v27  ;;  %v3982_v27 = vld [vmem:[%s5640_s3 + $0x28] sm:$0xff] }
0x18d5   :  { %v2949_v29 = vpop.permute.xlu0 %2948  ;;  %v2931_v30 = vpop.xlane.xlu1 %2930 }
0x18d6   :  { %4703 = vpow2.f32 %v2934_v28  ;;  %v2933_v34 = vsub.f32 %v2925_v25, %v2931_v30  ;;  %4398 = vmatpush3.msra.mxu0 %v2949_v29  ;;  %v3983_v29 = vld [vmem:[%s5640_s3 + $0x30] sm:$0xff]  ;;  %v3984_v30 = vld [vmem:[%s5640_s3 + $0x38] sm:$0xff] }
0x18d7   :  { %4407 = vmatprep.subr.mxu0 %v4799_v43 }
0x18d8   :  { %v2936_v31 = vmul.f32 1.442695, %v2933_v34  ;;  %v4563_v34 = vpack.c.bf16 %v3984_v30, %v3983_v29  ;;  %v3992_v30 = vld [vmem:[%s5642_s5 + $0x98] sm:$0xff] }
0x18d9   :  { %v3025_v35 = vpop.permute.xlu1 %3024 }
0x18da   :  { %4705 = vpow2.f32 %v2936_v31  ;;  %4403 = vmatpush3.msra.mxu1 %v3025_v35 }
0x18db   :  { %4412 = vmatprep.subr.mxu1 %v4799_v43 }
0x18dd   :  { %v3103_v38 = vpop.permute.xlu1 %3102 }
0x18e0   :  { %v4704_v36 = vpop.eup %4703 }
0x18e1   :  { %v2938_v32 = vsel %vm231_vm2, %v4704_v36, 0.0  ;;  %v3181_v44 = vpop.permute.xlu1 %3180 }
0x18e2   :  { %2939 = vadd.xlane.f32.xlu0 %v2938_v32 }
0x18e4   :  { %v4706_v39 = vpop.eup %4705 }
0x18e5   :  { %v2941_v10 = vsel %vm231_vm2, %v4706_v39, 0.0  ;;  %v3179_v51 = vpop.permute.xlu1 %3178 }
0x18e6   :  { %2942 = vadd.xlane.f32.xlu0 %v2941_v10 }
0x18fc   :  { %3100 = vrot.lane.b32.xlu0 %v5303_v37, %s4810_s24 }
0x196f   :  { %v2940_v24 = vpop.xlane.xlu0 %2939 }
0x1970   :  { %4707 = vrcp.f32 %v2940_v24 }
0x1973   :  { %v2943_v33 = vpop.xlane.xlu0 %2942 }
0x1974   :  { %4709 = vrcp.f32 %v2943_v33 }
0x1977   :  { %v3101_v37 = vpop.permute.xlu0 %3100 }
0x197a   :  { %v4708_v49 = vpop.eup %4707 }
0x197b   :  { %v2946_v40 = vmul.f32 %v4708_v49, %v4704_v36 }
0x197d   :  { %4400 = vmatmul.mubr.msk.f32.vlgmr.msra.gmra.mrb[20].mxu0 %vm231_vm2, %v2946_v40 }
0x197e   :  { %v4710_v41 = vpop.eup %4709  ;;  %4408 = vmatpush3.xpose.msk.msra.mxu0 %vm231_vm2, %v3103_v38  ;;  %4409 = vmatprep.mubr.msk.f32.mxu0 %vm4800_vm1, %v4799_v43 }
0x197f   :  { %v2947_v50 = vmul.f32 %v4710_v41, %v4706_v39  ;;  %4417 = vmatprep.subr.mxu0 %v4799_v43 }
0x1981   :  { %4405 = vmatmul.mubr.msk.f32.vlgmr.msra.gmra.mrb[42].mxu1 %vm231_vm2, %v2947_v50  ;;  %4410 = vmatmul.mubr.msk.f32.vlgmr.msra.gmra.mrb[22].mxu0 %vm231_vm2, %v3101_v37 }
0x1982   :  { %4413 = vmatpush3.xpose.msk.msra.mxu1 %vm231_vm2, %v3181_v44  ;;  %4414 = vmatprep.mubr.msk.f32.mxu1 %vm4800_vm1, %v4799_v43 }
0x1983   :  { %4422 = vmatprep.subr.mxu1 %v4799_v43  ;;  %4419 = vmatprep.mubr.msk.f32.mxu0 %vm4800_vm1, %v4799_v43 }
0x1985   :  { %4415 = vmatmul.mubr.msk.f32.vlgmr.msra.gmra.mrb[44].mxu1 %vm231_vm2, %v3179_v51 }
0x1986   :  { %4424 = vmatprep.mubr.msk.f32.mxu1 %vm4800_vm1, %v4799_v43 }
0x1a50   :  { %v3020_v53 = vpop.f32.mrb[20].mxu0 }
0x1a51   :  { %v4401_v47 = vpop.f32.mrb[21].mxu0 }
0x1a54   :  { %v3096_v48 = vpop.f32.mrb[42].mxu1  ;;  %v3174_v57 = vpop.f32.mrb[22].mxu0 }
0x1a55   :  { %v3256_v58 = vmul.f32 0.35355338, %v3174_v57  ;;  %v4406_v59 = vpop.f32.mrb[43].mxu1  ;;  %v4411_v60 = vpop.f32.mrb[23].mxu0 }
0x1a57   :  { %v3258_v5 = vsel %vm4969_vm3, %v3256_v58, -1e+30 }
0x1a58   :  { %v3252_v45 = vpop.f32.mrb[44].mxu1  ;;  %v3260_v16 = vsel %vm231_vm2, %v3258_v5, -inf }
0x1a59   :  { %v3257_v23 = vmul.f32 0.35355338, %v3252_v45  ;;  %3261 = vmax.xlane.f32.xlu0 %v3260_v16  ;;  %v4416_v52 = vpop.f32.mrb[45].mxu1 }
0x1a5b   :  { %v3259_v63 = vsel %vm4969_vm3, %v3257_v23, -1e+30 }
0x1a5c   :  { %v3263_v2 = vsel %vm231_vm2, %v3259_v63, -inf }
0x1a5d   :  { %3264 = vmax.xlane.f32.xlu1 %v3263_v2 }
0x1a6e   :  { %3358 = vrot.lane.b32.xlu1 %v5330_v62, %s4811_s1 }
0x1a72   :  { %3436 = vrot.lane.b32.xlu1 %v5406_v4, %s4812_s25 }
0x1a76   :  { %3438 = vrot.lane.b32.xlu1 %v5408_v7, %s4812_s25 }
0x1a7a   :  { %3446 = vrot.lane.b32.xlu1 %v3096_v48, %s5655_s2 }
0x1ae6   :  { %v3262_v3 = vpop.xlane.xlu0 %3261 }
0x1ae7   :  { %v3266_v6 = vsub.f32 %v3258_v5, %v3262_v3  ;;  %v3985_v3 = vld [vmem:[%s5641_s4 + $0x20] sm:$0xff] }
0x1ae9   :  { %v3268_v8 = vmul.f32 1.442695, %v3266_v6  ;;  %v3986_v6 = vld [vmem:[%s5641_s4 + $0x28] sm:$0xff] }
0x1aea   :  { %v3265_v11 = vpop.xlane.xlu1 %3264 }
0x1aeb   :  { %4711 = vpow2.f32 %v3268_v8  ;;  %v3267_v56 = vsub.f32 %v3259_v63, %v3265_v11  ;;  %v4567_v8 = vpack.c.bf16 %v3986_v6, %v3985_v3  ;;  %v3987_v11 = vld [vmem:[%s5641_s4 + $0x30] sm:$0xff]  ;;  %v4041_v6 = vld [vmem:[%s5643_s6 + $0x18] ss:$0 sm:$0xff] }
0x1aed   :  { %v3270_v13 = vmul.f32 1.442695, %v3267_v56  ;;  %v3988_v56 = vld [vmem:[%s5641_s4 + $0x38] sm:$0xff]  ;;  %s3941_s4 = scalar_lea.vmem [#allocation4], %s4044_s27 }
0x1aee   :  { %v3359_v14 = vpop.permute.xlu1 %3358 }
0x1aef   :  { %4713 = vpow2.f32 %v3270_v13  ;;  %4423 = vmatpush3.msra.mxu1 %v3359_v14  ;;  %v4571_v13 = vpack.c.bf16 %v3988_v56, %v3987_v11 }
0x1af0   :  { %4568 = vmatprep.subr.bf16.mxu1 %v4567_v8 }
0x1af2   :  { %v3437_v39 = vpop.permute.xlu1 %3436 }
0x1af3   :  { %v3458_v33 = vsel %vm231_vm2, %v5364_v26, %v3437_v39  ;;  %v3550_v26 = vrot.slane %v5274_v12, %v1686_v42 }
0x1af5   :  { %v4712_v15 = vpop.eup %4711 }
0x1af6   :  { %v3272_v62 = vsel %vm231_vm2, %v4712_v15, 0.0  ;;  %v3439_v10 = vpop.permute.xlu1 %3438 }
0x1af7   :  { %3273 = vadd.xlane.f32.xlu0 %v3272_v62  ;;  %v3459_v44 = vsel %vm231_vm2, %v5366_v22, %v3439_v10  ;;  %v3997_v10 = vld [vmem:[%s5642_s5 + $0xc0] sm:$0xff] }
0x1af9   :  { %v4714_v4 = vpop.eup %4713 }
0x1afa   :  { %v3275_v17 = vsel %vm231_vm2, %v4714_v4, 0.0  ;;  %v3447_v38 = vpop.permute.xlu1 %3446 }
0x1afb   :  { %3276 = vadd.xlane.f32.xlu0 %v3275_v17  ;;  %v3461_v50 = vsel %vm1595_vm5, %v3459_v44, %v3447_v38  ;;  %v3999_v38 = vld [vmem:[%s5642_s5 + $0xd0] sm:$0xff]  ;;  %v4002_v44 = vld [vmem:[%s5642_s5 + $0xe8] sm:$0xff] }
0x1b11   :  { %3282 = vrot.lane.b32.xlu0 %v5328_v61, %s4811_s1  ;;  %v3981_v61 = vld [vmem:[%s5640_s3 + $0x20] sm:$0xff] }
0x1b12   :  { %v4559_v28 = vpack.c.bf16 %v3982_v27, %v3981_v61 }
0x1b15   :  { %3444 = vrot.lane.b32.xlu0 %v3020_v53, %s5655_s2 }
0x1b84   :  { %v3274_v7 = vpop.xlane.xlu0 %3273 }
0x1b85   :  { %4715 = vrcp.f32 %v3274_v7 }
0x1b88   :  { %v3277_v18 = vpop.xlane.xlu0 %3276 }
0x1b89   :  { %4717 = vrcp.f32 %v3277_v18  ;;  %v3582_v18 = vrot.slane %v5274_v12, %v1718_v46  ;;  %v3989_v46 = vld [vmem:[%s5642_s5 + $0x80] sm:$0xff] }
0x1b8c   :  { %v3283_v19 = vpop.permute.xlu0 %3282 }
0x1b8d   :  { %4418 = vmatpush3.msra.mxu0 %v3283_v19 }
0x1b8e   :  { %4560 = vmatprep.subr.bf16.mxu0 %v4559_v28 }
0x1b8f   :  { %v4716_v20 = vpop.eup %4715 }
0x1b90   :  { %v3280_v25 = vmul.f32 %v4716_v20, %v4712_v15  ;;  %v3445_v24 = vpop.permute.xlu0 %3444 }
0x1b91   :  { %v3460_v49 = vsel %vm1595_vm5, %v3458_v33, %v3445_v24  ;;  %v3998_v24 = vld [vmem:[%s5642_s5 + $0xc8] sm:$0xff] }
0x1b92   :  { %4420 = vmatmul.mubr.msk.f32.vlgmr.msra.gmra.mrb[24].mxu0 %vm231_vm2, %v3280_v25  ;;  %v3588_v25 = vrot.slane %v5274_v12, %v1724_v9  ;;  %v4575_v9 = vpack.c.bf16 %v3990_v21, %v3989_v46  ;;  %v3991_v12 = vld [vmem:[%s5642_s5 + $0x90] sm:$0xff]  ;;  %v4591_v33 = vpack.c.bf16 %v3998_v24, %v3997_v10  ;;  %v3834_v21 = vld [vmem:[%s5646_s9 + $0x18] sm:$0xff]  ;;  %v4043_v24 = vld [vmem:[%s5645_s8 + $0x1] ss:$0 sm:$0xff] }
0x1b93   :  { %v4718_v1 = vpop.eup %4717  ;;  %4562 = vmatpush3.bf16.msra.mxu0 %v4559_v28 }
0x1b94   :  { %v3281_v0 = vmul.f32 %v4718_v1, %v4714_v4  ;;  %4564 = vmatprep.subr.bf16.mxu0 %v4563_v34 }
0x1b96   :  { %4425 = vmatmul.mubr.msk.f32.vlgmr.msra.gmra.mrb[46].mxu1 %vm231_vm2, %v3281_v0 }
0x1b97   :  { %4566 = vmatpush3.bf16.msra.mxu0 %v4563_v34  ;;  %4570 = vmatpush3.bf16.msra.mxu1 %v4567_v8  ;;  %v3993_v34 = vld [vmem:[%s5642_s5 + $0xa0] sm:$0xff] }
0x1b98   :  { %4572 = vmatprep.subr.bf16.mxu1 %v4571_v13  ;;  %4576 = vmatprep.subr.bf16.mxu0 %v4575_v9 }
0x1b9b   :  { %4574 = vmatpush3.bf16.msra.mxu1 %v4571_v13 }
0x1c65   :  { %v3354_v31 = vpop.f32.mrb[24].mxu0 }
0x1c66   :  { %3452 = vrot.lane.b32.xlu0 %v3354_v31, %s5656_s23  ;;  %v4421_v35 = vpop.f32.mrb[25].mxu0  ;;  %v3994_v31 = vld [vmem:[%s5642_s5 + $0xa8] sm:$0xff] }
0x1c67   :  { %v4583_v35 = vpack.c.bf16 %v3994_v31, %v3993_v34 }
0x1c69   :  { %v3430_v36 = vpop.f32.mrb[46].mxu1 }
0x1c6a   :  { %3454 = vrot.lane.b32.xlu1 %v3430_v36, %s5656_s23  ;;  %v4426_v32 = vpop.f32.mrb[47].mxu1  ;;  %v3995_v36 = vld [vmem:[%s5642_s5 + $0xb0] sm:$0xff] }
0x1c6b   :  { %v3996_v32 = vld [vmem:[%s5642_s5 + $0xb8] sm:$0xff] }
0x1c6c   :  { %v4587_v39 = vpack.c.bf16 %v3996_v32, %v3995_v36  ;;  %v4042_v32 = vld [vmem:[%s5645_s8] ss:$0 sm:$0xff]  ;;  %s4816_s8 = smov [#allocation4]  }
0x1c6d   :  { %s3915_s29 = sshll.u32 %s4816_s8, 4  ;;  %s3916_s29 = int_to_ptr.vmem [resolvable:$true] %s3915_s29 }
0x1c6e   :  { %s4747_s30 = scalar_lea.vmem %s3916_s29, 256  ;;  %p4752_p6 = scmp.lt.s32.totalorder %s3916_s29, %s3916_s29 }
0x1c6f   :  { %p4748_p5 = scmp.ne.s32.totalorder %s3916_s29, %s4747_s30  ;;  %p4753_p7 = scmp.lt.s32.totalorder %s4747_s30, %s4747_s30 }
0x1c71   :  { %p4754_p8 = por %p4753_p7, %p4752_p6 }
0x1c73   :  { %p4755_p9 = pnand %p4754_p8, %p4748_p5 }
0x1cd8   :  { %v3453_v40 = vpop.permute.xlu0 %3452 }
0x1cd9   :  { %v3462_v41 = vsel %vm1598_vm4, %v3460_v49, %v3453_v40  ;;  %v4000_v49 = vld [vmem:[%s5642_s5 + $0xd8] sm:$0xff] }
0x1cda   :  { %4435 = vmatprep.mubr.msk.f32.mxu0 %vm81_vm0, %v3462_v41  ;;  %v4595_v40 = vpack.c.bf16 %v4000_v49, %v3999_v38  ;;  %v4001_v41 = vld [vmem:[%s5642_s5 + $0xe0] sm:$0xff] }
0x1cdc   :  { %v3455_v37 = vpop.permute.xlu1 %3454 }
0x1cdd   :  { %v3463_v51 = vsel %vm1598_vm4, %v3461_v50, %v3455_v37  ;;  %v4599_v50 = vpack.c.bf16 %v4002_v44, %v4001_v41  ;;  %v4003_v37 = vld [vmem:[%s5642_s5 + $0xf0] sm:$0xff] }
0x1cde   :  { %4436 = vmatmul.mubr.msk.f32.vlgmr.msra.gmra.mrb[26].mxu0 %vm81_vm0, %v3463_v51  ;;  %v4004_v51 = vld [vmem:[%s5642_s5 + $0xf8] sm:$0xff] }
0x1cdf   :  { %4578 = vmatpush3.bf16.msra.mxu0 %v4575_v9 }
0x1db1   :  { %v4437_v53 = vpop.f32.mrb[26].mxu0 }
0x1db2   :  { %v3546_v47 = vadd.f32 %v4437_v53, %v5247_v54  ;;  %v3536_v48 = vpop.f32.mrb[27].mxu0  ;;  %v4036_v53 = vld [vmem:[%s5644_s7 + $0x1] ss:$0 sm:$0xff] }
0x1db3   :  { %v3545_v57 = vadd.f32 %v3536_v48, %v5249_v55 }
0x1db4   :  { %v5497_v58 = vadd.f32 %v3550_v26, %v3546_v47 }
0x1db5   :  { %v5499_v22 = vadd.f32 %v3550_v26, %v3545_v57  ;;  %v4603_v26 = vpack.c.bf16 %v4004_v51, %v4003_v37 }
0x1db6   :  { %v3556_v59 = vsel %vm81_vm0, %v5497_v58, 0.0 }
0x1db7   :  { %3557 = vadd.xlane.f32.xlu1 %v3556_v59  ;;  %v3553_v60 = vsel %vm81_vm0, %v5499_v22, 0.0 }
0x1db8   :  { %3554 = vadd.xlane.f32.xlu0 %v3553_v60 }
0x1e44   :  { %v3558_v5 = vpop.xlane.xlu1 %3557 }
0x1e45   :  { %v3560_v42 = vmul.f32 0.03125, %v3558_v5  ;;  %v3555_v45 = vpop.xlane.xlu0 %3554 }
0x1e46   :  { %v3559_v16 = vmul.f32 0.03125, %v3555_v45 }
0x1e47   :  { %v3562_v54 = vsub.f32 %v5497_v58, %v3560_v42 }
0x1e48   :  { %v3561_v55 = vsub.f32 %v5499_v22, %v3559_v16 }
0x1e49   :  { %v3564_v63 = vmul.f32 %v3562_v54, %v3562_v54 }
0x1e4a   :  { %v3563_v23 = vmul.f32 %v3561_v55, %v3561_v55 }
0x1e4b   :  { %v3568_v2 = vsel %vm81_vm0, %v3564_v63, 0.0 }
0x1e4c   :  { %v3565_v52 = vsel %vm81_vm0, %v3563_v23, 0.0 }
0x1e4d   :  { %3566 = vadd.xlane.f32.xlu0 %v3565_v52 }
0x1e51   :  { %3569 = vadd.xlane.f32.xlu0 %v3568_v2 }
0x1eda   :  { %v3567_v14 = vpop.xlane.xlu0 %3566 }
0x1edb   :  { %v3571_v15 = vmul.f32 0.03125, %v3567_v14 }
0x1edd   :  { %v3573_v62 = vadd.f32 1e-05, %v3571_v15 }
0x1ede   :  { %v3570_v4 = vpop.xlane.xlu0 %3569 }
0x1edf   :  { %4719 = vrsqrt.f32 %v3573_v62  ;;  %v3572_v17 = vmul.f32 0.03125, %v3570_v4 }
0x1ee1   :  { %v3574_v7 = vadd.f32 1e-05, %v3572_v17 }
0x1ee3   :  { %4721 = vrsqrt.f32 %v3574_v7 }
0x1ee9   :  { %v4720_v19 = vpop.eup %4719 }
0x1eea   :  { %v3577_v20 = vmul.f32 %v4720_v19, %v3561_v55 }
0x1eec   :  { %v3583_v1 = vmul.f32 %v3582_v18, %v3577_v20 }
0x1eed   :  { %v4722_v0 = vpop.eup %4721 }
0x1eee   :  { %v3578_v61 = vmul.f32 %v4722_v0, %v3562_v54  ;;  %v3589_v27 = vadd.f32 %v3588_v25, %v3583_v1 }
0x1ef0   :  { %v3584_v28 = vmul.f32 %v3582_v18, %v3578_v61  ;;  %4446 = vmatprep.mubr.msk.f32.mxu1 %vm81_vm0, %v3589_v27  ;;  %v3831_v61 = vld [vmem:[%s5646_s9] sm:$0xff]  ;;  %v3832_v27 = vld [vmem:[%s5646_s9 + $0x8] sm:$0xff] }
0x1ef1   :  { %v4608_v46 = vpack.c.bf16 %v3832_v27, %v3831_v61 }
0x1ef2   :  { %v3590_v29 = vadd.f32 %v3588_v25, %v3584_v28  ;;  %v3833_v28 = vld [vmem:[%s5646_s9 + $0x10] sm:$0xff] }
0x1ef3   :  { %v4611_v9 = vpack.c.bf16 %v3834_v21, %v3833_v28 }
0x1ef4   :  { %4447 = vmatmul.mubr.msk.f32.vlgmr.msra.gmra.mrb[48].mxu1 %vm81_vm0, %v3590_v29  ;;  %v4815_v29 = vmov 0.0|0.0  }
0x1ef5   :  { %4492 = vmatprep.mubr.msk.f32.mxu1 %vm4800_vm1, %v4799_v43  ;;  %v4579_v43 = vpack.c.bf16 %v3992_v30, %v3991_v12  ;;  %4607 = vmatprep.subr.bf16.mxu1 %v4815_v29 }
0x1ef6   :  { %4609 = vmatpush3.bf16.msra.mxu1 %v4608_v46 }
0x1ef7   :  { %4580 = vmatprep.subr.bf16.mxu0 %v4579_v43  ;;  %4610 = vmatprep.subr.bf16.mxu1 %v4815_v29 }
0x1ef8   :  { %4582 = vmatpush3.bf16.msra.mxu0 %v4579_v43 }
0x1ef9   :  { %4584 = vmatprep.subr.bf16.mxu0 %v4583_v35 }
0x1efa   :  { %4612 = vmatpush3.bf16.msra.mxu1 %v4611_v9 }
0x1efc   :  { %4586 = vmatpush3.bf16.msra.mxu0 %v4583_v35 }
0x1efd   :  { %4588 = vmatprep.subr.bf16.mxu0 %v4587_v39 }
0x1f00   :  { %4590 = vmatpush3.bf16.msra.mxu0 %v4587_v39 }
0x1f01   :  { %4592 = vmatprep.subr.bf16.mxu0 %v4591_v33 }
0x1f04   :  { %4594 = vmatpush3.bf16.msra.mxu0 %v4591_v33 }
0x1f05   :  { %4596 = vmatprep.subr.bf16.mxu0 %v4595_v40 }
0x1f08   :  { %4598 = vmatpush3.bf16.msra.mxu0 %v4595_v40 }
0x1f09   :  { %4600 = vmatprep.subr.bf16.mxu0 %v4599_v50 }
0x1f0c   :  { %4602 = vmatpush3.bf16.msra.mxu0 %v4599_v50 }
0x1f0d   :  { %4604 = vmatprep.subr.bf16.mxu0 %v4603_v26 }
0x1f10   :  { %4606 = vmatpush3.bf16.msra.mxu0 %v4603_v26 }
0x1fc7   :  { %v4448_v47 = vpop.f32.mrb[48].mxu1 }
0x1fc8   :  { %v3675_v48 = vadd.f32 %v4448_v47, %v4036_v53  ;;  %v3669_v57 = vpop.f32.mrb[49].mxu1 }
0x1fc9   :  { %v3670_v59 = vadd.f32 %v4036_v53, %v3669_v57 }
0x1fca   :  { %v4040_v60 = vmul.f32 -1.702, %v3675_v48 }
0x1fcb   :  { %v4039_v5 = vmul.f32 -1.702, %v3670_v59 }
0x1fcc   :  { %v3684_v42 = vmul.f32 1.442695, %v4040_v60 }
0x1fcd   :  { %v3682_v45 = vmul.f32 1.442695, %v4039_v5 }
0x1fce   :  { %4723 = vpow2.f32 %v3684_v42 }
0x1fcf   :  { %4725 = vpow2.f32 %v3682_v45 }
0x1fd8   :  { %v4724_v16 = vpop.eup %4723 }
0x1fd9   :  { %v4726_v54 = vpop.eup %4725  ;;  %v3687_v55 = vadd.f32 1.0, %v4724_v16 }
0x1fda   :  { %v3686_v23 = vadd.f32 1.0, %v4726_v54 }
0x1fdb   :  { %4727 = vrcp.f32 %v3687_v55 }
0x1fdc   :  { %4729 = vrcp.f32 %v3686_v23 }
0x1fe5   :  { %v4728_v52 = vpop.eup %4727 }
0x1fe6   :  { %v4730_v63 = vpop.eup %4729  ;;  %v3693_v3 = vmul.f32 %v4728_v52, %v3675_v48 }
0x1fe7   :  { %v3692_v2 = vmul.f32 %v4730_v63, %v3670_v59 }
0x1fe9   :  { %4481 = vmatprep.mubr.f32.mxu0 %v3692_v2 }
0x1fea   :  { %4482 = vmatmul.mubr.f32.vlgmr.msra.gmra.mrb[28].mxu0 %v3693_v3 }
0x20bd   :  { %v4483_v8 = vpop.f32.mrb[28].mxu0 }
0x20be   :  { %v3770_v11 = vadd.f32 %v4483_v8, %v5497_v58  ;;  %v3760_v56 = vpop.f32.mrb[29].mxu0 }
0x20bf   :  { %v3769_v13 = vadd.f32 %v3760_v56, %v5499_v22 }
0x20c0   :  { %v3776_v14 = vadd.f32 %v4041_v6, %v3770_v11 }
0x20c1   :  { %v3775_v15 = vadd.f32 %v4041_v6, %v3769_v13 }
0x20c2   :  { %v3782_v62 = vsel %vm81_vm0, %v3776_v14, 0.0 }
0x20c3   :  { %3783 = vadd.xlane.f32.xlu1 %v3782_v62  ;;  %v3779_v4 = vsel %vm81_vm0, %v3775_v15, 0.0 }
0x20c4   :  { %3780 = vadd.xlane.f32.xlu0 %v3779_v4 }
0x2150   :  { %v3784_v17 = vpop.xlane.xlu1 %3783 }
0x2151   :  { %v3786_v7 = vmul.f32 0.03125, %v3784_v17  ;;  %v3781_v18 = vpop.xlane.xlu0 %3780 }
0x2152   :  { %v3785_v19 = vmul.f32 0.03125, %v3781_v18 }
0x2153   :  { %v3788_v20 = vsub.f32 %v3776_v14, %v3786_v7 }
0x2154   :  { %v3787_v25 = vsub.f32 %v3775_v15, %v3785_v19 }
0x2155   :  { %v3790_v1 = vmul.f32 %v3788_v20, %v3788_v20 }
0x2156   :  { %v3789_v0 = vmul.f32 %v3787_v25, %v3787_v25 }
0x2157   :  { %v3794_v58 = vsel %vm81_vm0, %v3790_v1, 0.0 }
0x2158   :  { %3795 = vadd.xlane.f32.xlu1 %v3794_v58  ;;  %v3791_v22 = vsel %vm81_vm0, %v3789_v0, 0.0 }
0x2159   :  { %3792 = vadd.xlane.f32.xlu0 %v3791_v22 }
0x21e5   :  { %v3796_v12 = vpop.xlane.xlu1 %3795 }
0x21e6   :  { %v3798_v30 = vmul.f32 0.03125, %v3796_v12  ;;  %v3793_v43 = vpop.xlane.xlu0 %3792 }
0x21e7   :  { %v3797_v34 = vmul.f32 0.03125, %v3793_v43 }
0x21e8   :  { %v3800_v31 = vadd.f32 1e-05, %v3798_v30 }
0x21e9   :  { %v3799_v35 = vadd.f32 1e-05, %v3797_v34 }
0x21ea   :  { %4731 = vrsqrt.f32 %v3800_v31 }
0x21eb   :  { %4733 = vrsqrt.f32 %v3799_v35 }
0x21f4   :  { %v4732_v36 = vpop.eup %4731 }
0x21f5   :  { %v4734_v39 = vpop.eup %4733  ;;  %v3804_v10 = vmul.f32 %v4732_v36, %v3788_v20 }
0x21f6   :  { %v3803_v33 = vmul.f32 %v4734_v39, %v3787_v25 }
0x21f7   :  { %v3810_v38 = vmul.f32 %v4042_v32, %v3804_v10 }
0x21f8   :  { %v3809_v49 = vmul.f32 %v4042_v32, %v3803_v33 }
0x21f9   :  { %v3816_v40 = vadd.f32 %v4043_v24, %v3810_v38 }
0x21fa   :  { %v3815_v41 = vadd.f32 %v4043_v24, %v3809_v49 }
0x21fb   :  { %3818 = vst.msk [vmem:[#allocation4 + $0x8] sm:$0xff] %vm81_vm0, %v3816_v40 }
0x21fc   :  { %3817 = vst.msk [vmem:[#allocation4] sm:$0xff] %vm81_vm0, %v3815_v41 }
0x2203   :  { %v4045_v44 = vld [vmem:[%s3941_s4 + $0x8] sm:$0x1]  ;;  %v3821_v37 = vld [vmem:[%s3820_s28] sm:$0x1] }
0x2204   :  { %v3827_v50 = vrot.slane %v4045_v44, 7 }
0x2206   :  { %v3830_v51 = vsel %vm3829_vm6, %v3821_v37, %v3827_v50 }
0x2207   :  { %4493 = vmatmul.mubr.msk.f32.vlgmr.msra.gmra.mrb[50].mxu1 %vm81_vm0, %v3830_v51 }
0x2208   :  { %4758 = shalt.err (!%p4755_p9)
}
0x2209   :  { %s4759_s15 = scalar_lea.hbm %s5647_s10, 256 }
0x220a   :  { %p4760_p10 = scmp.ne.s32.totalorder %s5647_s10, %s4759_s15  ;;  %p4763_p11 = scmp.lt.u32.totalorder %s4759_s15, %s5647_s10 }
0x220c   :  { %p4765_p12 = pnand %p4763_p11, %p4760_p10 }
0x220e   :  { %4768 = shalt.err (!%p4765_p12)
}
0x220f   :  { %s4817_s5 = smov 128   ;;  %s4818_s20 = smov [#allocation6]   ;;  %vm3908_vm7 = vcmask 123904  }
0x2210   :  { %3921 = dma.vmem_to_hbm [thread:$0]  %s3916_s29, 256, %s5647_s10, [#allocation5], %s4817_s5, %s4817_s5, %s4812_s25  }
0x2211   :  { %s3928_s21 = sshll.u32 %s4818_s20, 4  ;;  %s3929_s21 = int_to_ptr.vmem [resolvable:$true] %s3928_s21 }
0x2212   :  { %s4769_s22 = scalar_lea.vmem %s3929_s21, 32  ;;  %p4774_p0 = scmp.lt.s32.totalorder %s3929_s21, %s3929_s21 }
0x2213   :  { %p4770_p13 = scmp.ne.s32.totalorder %s3929_s21, %s4769_s22  ;;  %p4775_p1 = scmp.lt.s32.totalorder %s4769_s22, %s4769_s22 }
0x2215   :  { %p4776_p2 = por %p4775_p1, %p4774_p0 }
0x2217   :  { %p4777_p3 = pnand %p4776_p2, %p4770_p13 }
0x22da   :  { %v3904_v26 = vpop.f32.mrb[50].mxu1 }
0x22db   :  { %3909 = vst.msk [vmem:[#allocation6] sm:$0x3] %vm3908_vm7, %v3904_v26  ;;  %v4494_v53 = vpop.f32.mrb[51].mxu1 }
0x22dc   :  { %4780 = shalt.err (!%p4777_p3)
}
0x22dd   :  { %s4781_s0 = scalar_lea.hbm %s5648_s11, 32 }
0x22de   :  { %p4782_p4 = scmp.ne.s32.totalorder %s5648_s11, %s4781_s0  ;;  %p4785_p5 = scmp.lt.u32.totalorder %s4781_s0, %s5648_s11 }
0x22e0   :  { %p4787_p6 = pnand %p4785_p5, %p4782_p4 }
0x22e2   :  { %4790 = shalt.err (!%p4787_p6)
}
0x22e3   :  { %3931 = dma.vmem_to_hbm [thread:$0]  %s3929_s21, 32, %s5648_s11, [#allocation7]  }
0x22e4   :  { %4793 = dma.done.wait [#allocation5], 256  }
0x22e5   :  { %4794 = vsyncadd [#allocation5], 4294967040 }
0x22e6   :  { %4795 = dma.done.wait [#allocation7], 32  }
0x22e7   :  { %4796 = vsyncadd [#allocation7], 4294967264 }
0x22e8   :  { %3938 = vsyncpa [#allocation5], 1 }
0x22e9   :  { %3939 = vsyncpa [#allocation7], 1 }

</bundles_post_ra>
